<compile_context>
chip_gen: v7x
topology: tpu7x:2x2x1
jax: 0.10.0
libtpu: 0.0.40
codegen_flags: <defaults>
</compile_context>

<pallas_src>
import functools
import math

import jax
import jax.numpy as jnp
from jax.experimental import pallas as pl
from jax.experimental.pallas import tpu as pltpu

# ---------------- config (small, consistent with the module) ----------------
VOCAB    = 50
HIDDEN   = 32      # config.hidden_dim
N_HEADS  = 4       # config.n_heads
HEAD_DIM = HIDDEN // N_HEADS
FF_DIM   = 64      # PositionwiseFeedForward inner dim
N_LAYERS = 2       # config.n_layers
B, S     = 2, 8
EPS      = 1e-5    # nn.LayerNorm default


# ---------------- shared math ----------------
def _layernorm(x, gamma, beta):
    mu = jnp.mean(x, axis=-1, keepdims=True)
    var = jnp.mean((x - mu) ** 2, axis=-1, keepdims=True)
    return (x - mu) * jax.lax.rsqrt(var + EPS) * gamma + beta


# ---------------- fused Pallas kernel ----------------
def fused_encoder_kernel(tok_ref, emb_ref, pe_ref, bias_ref,
                         wqkv_ref, bqkv_ref, wo_ref, bo_ref,
                         ln1g_ref, ln1b_ref, ln2g_ref, ln2b_ref,
                         w1_ref, b1_ref, w2_ref, b2_ref,
                         fing_ref, finb_ref,
                         o_ref, *, n_layers, n_heads, head_dim, hidden):
    """Whole encoder for the whole (flattened) batch in one invocation.

    tok_ref : (M, 1) int32 token ids, M = B*S (batch flattened on sublanes)
    emb_ref : (VOCAB, D) embedding table
    pe_ref  : (M, D) positional encoding (pre-tiled per flattened row)
    bias_ref: (M, M) additive attention bias (block-diagonal batch mask + key padding)
    per-layer weights are stacked along a leading layer axis.
    """
    M = tok_ref.shape[0]
    D = hidden
    vocab = emb_ref.shape[0]
    scale = 1.0 / math.sqrt(head_dim)
    f32 = jnp.float32

    # ---- embeddings: one-hot MXU gather (avoids data-dependent indexing) ----
    tok = tok_ref[...]                                                   # (M, 1) int32
    onehot = (tok == jax.lax.broadcasted_iota(jnp.int32, (M, vocab), 1)).astype(f32)
    x = (jnp.dot(onehot, emb_ref[...], preferred_element_type=f32) * math.sqrt(D)
         + pe_ref[...])                                                  # (M, D)

    # ---- hoisted attention bias, tiled once across heads (sublane-aligned concat) ----
    bias = bias_ref[...]                                                 # (M, M)
    bias_tiled = jnp.concatenate([bias] * n_heads, axis=0)               # (H*M, M)

    for l in range(n_layers):  # unrolled: weights stay resident, x never leaves vregs/VMEM
        # ---- sublayer 0: x + SelfAttn(LayerNorm(x)) ----
        xn = _layernorm(x, ln1g_ref[l], ln1b_ref[l])
        qkv = jnp.dot(xn, wqkv_ref[l], preferred_element_type=f32) + bqkv_ref[l]  # (M, 3D)
        q = qkv[:, 0 * D:1 * D]
        k = qkv[:, 1 * D:2 * D]
        v = qkv[:, 2 * D:3 * D]

        # all-head scores stacked on the sublane axis -> one batched softmax
        s = jnp.concatenate(
            [jnp.dot(q[:, h * head_dim:(h + 1) * head_dim],
                     k[:, h * head_dim:(h + 1) * head_dim].T,
                     preferred_element_type=f32) for h in range(n_heads)],
            axis=0) * scale + bias_tiled                                 # (H*M, M)
        s_max = jnp.max(s, axis=-1, keepdims=True)
        p = jnp.exp(s - s_max)
        p = p * pl.reciprocal(jnp.sum(p, axis=-1, keepdims=True), approx=True)

        # per-head output projection: concat(heads) @ Wo == sum_h head_h @ Wo[h*dh:(h+1)*dh]
        # TODO(synk): single lane-concat(heads) @ Wo avoided -- unaligned minor-dim concat
        #             (8-wide pieces) risks Mosaic lowering limits; accumulation is equivalent.
        attn = jnp.broadcast_to(bo_ref[l], (M, D)).astype(f32)
        for h in range(n_heads):
            lo = h * head_dim
            head = jnp.dot(p[h * M:(h + 1) * M, :], v[:, lo:lo + head_dim],
                           preferred_element_type=f32)                   # (M, dh)
            attn = attn + jnp.dot(head, wo_ref[l][lo:lo + head_dim, :],
                                  preferred_element_type=f32)
        x = x + attn

        # ---- sublayer 1: x + FFN(LayerNorm(x)) ----
        xn = _layernorm(x, ln2g_ref[l], ln2b_ref[l])
        h1 = jnp.maximum(
            jnp.dot(xn, w1_ref[l], preferred_element_type=f32) + b1_ref[l], 0.0)
        x = x + jnp.dot(h1, w2_ref[l], preferred_element_type=f32) + b2_ref[l]

    # ---- final LayerNorm ----
    o_ref[...] = _layernorm(x, fing_ref[...], finb_ref[...]).astype(o_ref.dtype)


# ---------------- wrapper ----------------
def standard_encoder_forward(tokens, e_mask, params):
    Bd, Sd = tokens.shape
    D = HIDDEN
    M = Bd * Sd

    # ---- pack per-layer params: stack along a leading layer axis, fuse QKV ----
    def stack(name):
        return jnp.stack([lp[name] for lp in params['layers']], axis=0)

    wqkv = jnp.stack([jnp.concatenate([lp['wq'], lp['wk'], lp['wv']], axis=1)
                      for lp in params['layers']], axis=0)               # (L, D, 3D)
    bqkv = jnp.stack([jnp.concatenate([lp['bq'], lp['bk'], lp['bv']], axis=1)
                      for lp in params['layers']], axis=0)               # (L, 1, 3D)
    wo, bo = stack('wo'), stack('bo')
    ln1g, ln1b = stack('ln1_g'), stack('ln1_b')
    ln2g, ln2b = stack('ln2_g'), stack('ln2_b')
    w1, b1, w2, b2 = stack('w1'), stack('b1'), stack('w2'), stack('b2')

    # ---- flattened-batch auxiliary inputs ----
    tok_flat = tokens.reshape(M, 1).astype(jnp.int32)
    pe_flat = jnp.tile(params['pe'][:Sd], (Bd, 1)).astype(jnp.float32)   # (M, D)

    # block-diagonal (per-batch) + key-padding additive bias, precomputed once
    batch_id = jnp.repeat(jnp.arange(Bd), Sd)                            # (M,)
    same_batch = batch_id[:, None] == batch_id[None, :]
    key_ok = ~e_mask.reshape(-1)                                         # True = valid key
    bias = jnp.where(same_batch & key_ok[None, :], 0.0, -1e9).astype(jnp.float32)  # (M, M)

    inputs = [tok_flat, params['emb'], pe_flat, bias,
              wqkv, bqkv, wo, bo, ln1g, ln1b, ln2g, ln2b, w1, b1, w2, b2,
              params['fin_g'], params['fin_b']]

    kernel = functools.partial(fused_encoder_kernel, n_layers=N_LAYERS,
                               n_heads=N_HEADS, head_dim=HEAD_DIM, hidden=D)
    out = pl.pallas_call(
        kernel,
        out_shape=jax.ShapeDtypeStruct((M, D), jnp.float32),
        in_specs=[pl.BlockSpec(memory_space=pltpu.MemorySpace.VMEM) for _ in inputs],
        out_specs=pl.BlockSpec(memory_space=pltpu.MemorySpace.VMEM),
    )(*inputs)
    return out.reshape(Bd, Sd, D)


# ---------------- deterministic parameter init ----------------
def sinusoidal_pe(seq_len, dim):
    pos = jnp.arange(seq_len, dtype=jnp.float32)[:, None]
    i = jnp.arange(0, dim, 2, dtype=jnp.float32)
    angle = pos / jnp.power(10000.0, i / dim)
    pe = jnp.zeros((seq_len, dim), jnp.float32)
    pe = pe.at[:, 0::2].set(jnp.sin(angle))
    pe = pe.at[:, 1::2].set(jnp.cos(angle))
    return pe


def init_params(key):
    D, F = HIDDEN, FF_DIM
    keys = jax.random.split(key, 1 + N_LAYERS)
    params = {
        'emb': jax.random.normal(keys[0], (VOCAB, D), jnp.float32) * 0.02,
        'pe': sinusoidal_pe(S, D),
        'fin_g': jnp.ones((1, D), jnp.float32),
        'fin_b': jnp.zeros((1, D), jnp.float32),
        'layers': [],
    }
    for l in range(N_LAYERS):
        k = jax.random.split(keys[1 + l], 6)
        sd = 1.0 / math.sqrt(D)
        lp = dict(
            wq=jax.random.normal(k[0], (D, D), jnp.float32) * sd, bq=jnp.zeros((1, D), jnp.float32),
            wk=jax.random.normal(k[1], (D, D), jnp.float32) * sd, bk=jnp.zeros((1, D), jnp.float32),
            wv=jax.random.normal(k[2], (D, D), jnp.float32) * sd, bv=jnp.zeros((1, D), jnp.float32),
            wo=jax.random.normal(k[3], (D, D), jnp.float32) * sd, bo=jnp.zeros((1, D), jnp.float32),
            ln1_g=jnp.ones((1, D), jnp.float32), ln1_b=jnp.zeros((1, D), jnp.float32),
            ln2_g=jnp.ones((1, D), jnp.float32), ln2_b=jnp.zeros((1, D), jnp.float32),
            w1=jax.random.normal(k[4], (D, F), jnp.float32) * sd, b1=jnp.zeros((1, F), jnp.float32),
            w2=jax.random.normal(k[5], (F, D), jnp.float32) * (1.0 / math.sqrt(F)),
            b2=jnp.zeros((1, D), jnp.float32),
        )
        params['layers'].append(lp)
    return params


# ---------------- pure-JAX reference (for correctness check) ----------------
def reference_forward(tokens, e_mask, params):
    D, H, Dh = HIDDEN, N_HEADS, HEAD_DIM
    x = params['emb'][tokens] * math.sqrt(D) + params['pe'][None, :tokens.shape[1], :]
    x = x.astype(jnp.float32)
    bias = jnp.where(e_mask, -1e9, 0.0)[:, None, None, :]     # (B,1,1,S)
    Bd, Sd = tokens.shape
    for lp in params['layers']:
        xn = _layernorm(x, lp['ln1_g'], lp['ln1_b'])
        q = xn @ lp['wq'] + lp['bq']
        k = xn @ lp['wk'] + lp['bk']
        v = xn @ lp['wv'] + lp['bv']
        qh = q.reshape(Bd, Sd, H, Dh).transpose(0, 2, 1, 3)
        kh = k.reshape(Bd, Sd, H, Dh).transpose(0, 2, 1, 3)
        vh = v.reshape(Bd, Sd, H, Dh).transpose(0, 2, 1, 3)
        s = jnp.einsum('bhqd,bhkd->bhqk', qh, kh) / math.sqrt(Dh) + bias
        p = jax.nn.softmax(s, axis=-1)
        o = jnp.einsum('bhqk,bhkd->bhqd', p, vh).transpose(0, 2, 1, 3).reshape(Bd, Sd, D)
        x = x + o @ lp['wo'] + lp['bo']
        xn = _layernorm(x, lp['ln2_g'], lp['ln2_b'])
        x = x + jnp.maximum(xn @ lp['w1'] + lp['b1'], 0.0) @ lp['w2'] + lp['b2']
    return _layernorm(x, params['fin_g'], params['fin_b'])


if __name__ == "__main__":
    key = jax.random.PRNGKey(0)
    k_tok, k_par = jax.random.split(key)
    tokens = jax.random.randint(k_tok, (B, S), 0, VOCAB, dtype=jnp.int32)
    # key_padding_mask: True == padded position (ignored by attention)
    e_mask = jnp.zeros((B, S), dtype=bool).at[1, -2:].set(True)
    params = init_params(k_par)

    out = standard_encoder_forward(tokens, e_mask, params)
    out = jax.block_until_ready(out)

    with jax.default_matmul_precision("highest"):
        ref = jax.block_until_ready(reference_forward(tokens, e_mask, params))

    assert out.shape == (B, S, HIDDEN) and out.dtype == jnp.float32
    assert bool(jnp.all(jnp.isfinite(out)))
    assert bool(jnp.allclose(out, ref, atol=2e-2, rtol=2e-2)), \
        f"max abs err {float(jnp.max(jnp.abs(out - ref)))}"
    print("KERNEL_OK")
</pallas_src>

<mosaic_0001>
module attributes {stable_mosaic.version = 11 : i64} {
  func.func @fused_encoder_kernel(%arg0: memref<16x1xi32, #tpu.memory_space<vmem>>, %arg1: memref<50x32xf32, #tpu.memory_space<vmem>>, %arg2: memref<16x32xf32, #tpu.memory_space<vmem>>, %arg3: memref<16x16xf32, #tpu.memory_space<vmem>>, %arg4: memref<2x32x96xf32, #tpu.memory_space<vmem>>, %arg5: memref<2x1x96xf32, #tpu.memory_space<vmem>>, %arg6: memref<2x32x32xf32, #tpu.memory_space<vmem>>, %arg7: memref<2x1x32xf32, #tpu.memory_space<vmem>>, %arg8: memref<2x1x32xf32, #tpu.memory_space<vmem>>, %arg9: memref<2x1x32xf32, #tpu.memory_space<vmem>>, %arg10: memref<2x1x32xf32, #tpu.memory_space<vmem>>, %arg11: memref<2x1x32xf32, #tpu.memory_space<vmem>>, %arg12: memref<2x32x64xf32, #tpu.memory_space<vmem>>, %arg13: memref<2x1x64xf32, #tpu.memory_space<vmem>>, %arg14: memref<2x64x32xf32, #tpu.memory_space<vmem>>, %arg15: memref<2x1x32xf32, #tpu.memory_space<vmem>>, %arg16: memref<1x32xf32, #tpu.memory_space<vmem>>, %arg17: memref<1x32xf32, #tpu.memory_space<vmem>>, %arg18: memref<16x32xf32, #tpu.memory_space<vmem>>) attributes {dimension_semantics = [], scalar_prefetch = 0 : i64, scratch_operands = 0 : i64, tpu.core_type = #tpu.core_type<tc>} {
    %c0 = arith.constant 0 : index
    %c0_0 = arith.constant 0 : index
    %0 = vector.load %arg0[%c0, %c0_0] : memref<16x1xi32, #tpu.memory_space<vmem>>, vector<16x1xi32>
    %1 = tpu.iota {dimensions = array<i32: 1>} : vector<16x50xi32>
    %2 = vector.broadcast %0 : vector<16x1xi32> to vector<16x50xi32>
    %3 = arith.cmpi eq, %2, %1 : vector<16x50xi32>
    %4 = arith.extui %3 : vector<16x50xi1> to vector<16x50xi32>
    %5 = arith.sitofp %4 : vector<16x50xi32> to vector<16x50xf32>
    %c0_1 = arith.constant 0 : index
    %c0_2 = arith.constant 0 : index
    %6 = vector.load %arg1[%c0_1, %c0_2] : memref<50x32xf32, #tpu.memory_space<vmem>>, vector<50x32xf32>
    %cst = arith.constant dense<0.000000e+00> : vector<16x32xf32>
    %7 = tpu.matmul %5, %6, %cst {dimension_numbers = #tpu.dot_dimension_numbers<[1], [0], [0], [1], [0, 0, 1, 1], [], []>} : vector<16x50xf32>, vector<50x32xf32>, vector<16x32xf32> -> vector<16x32xf32>
    %cst_3 = arith.constant 5.65685415 : f32
    %8 = vector.broadcast %cst_3 : f32 to vector<16x32xf32>
    %9 = arith.mulf %7, %8 : vector<16x32xf32>
    %c0_4 = arith.constant 0 : index
    %c0_5 = arith.constant 0 : index
    %10 = vector.load %arg2[%c0_4, %c0_5] : memref<16x32xf32, #tpu.memory_space<vmem>>, vector<16x32xf32>
    %11 = arith.addf %9, %10 : vector<16x32xf32>
    %c0_6 = arith.constant 0 : index
    %c0_7 = arith.constant 0 : index
    %12 = vector.load %arg3[%c0_6, %c0_7] : memref<16x16xf32, #tpu.memory_space<vmem>>, vector<16x16xf32>
    %13 = tpu.concatenate %12, %12, %12, %12 in 0 : vector<16x16xf32>, vector<16x16xf32>, vector<16x16xf32>, vector<16x16xf32> -> vector<64x16xf32>
    %c0_8 = arith.constant 0 : index
    %c0_9 = arith.constant 0 : index
    %c0_10 = arith.constant 0 : index
    %14 = vector.load %arg8[%c0_8, %c0_9, %c0_10] : memref<2x1x32xf32, #tpu.memory_space<vmem>>, vector<1x1x32xf32>
    %15 = vector.shape_cast %14 : vector<1x1x32xf32> to vector<1x32xf32>
    %c0_11 = arith.constant 0 : index
    %c0_12 = arith.constant 0 : index
    %c0_13 = arith.constant 0 : index
    %16 = vector.load %arg9[%c0_11, %c0_12, %c0_13] : memref<2x1x32xf32, #tpu.memory_space<vmem>>, vector<1x1x32xf32>
    %17 = vector.shape_cast %16 : vector<1x1x32xf32> to vector<1x32xf32>
    %cst_14 = arith.constant dense<0.000000e+00> : vector<16xf32>
    %18 = vector.multi_reduction <add>, %11, %cst_14 [1] : vector<16x32xf32> to vector<16xf32>
    %19 = vector.shape_cast %18 : vector<16xf32> to vector<16x1xf32>
    %cst_15 = arith.constant 3.200000e+01 : f32
    %20 = vector.broadcast %cst_15 : f32 to vector<16x1xf32>
    %21 = arith.divf %19, %20 : vector<16x1xf32>
    %22 = vector.broadcast %21 : vector<16x1xf32> to vector<16x32xf32>
    %23 = arith.subf %11, %22 : vector<16x32xf32>
    %24 = arith.mulf %23, %23 : vector<16x32xf32>
    %cst_16 = arith.constant dense<0.000000e+00> : vector<16xf32>
    %25 = vector.multi_reduction <add>, %24, %cst_16 [1] : vector<16x32xf32> to vector<16xf32>
    %26 = vector.shape_cast %25 : vector<16xf32> to vector<16x1xf32>
    %cst_17 = arith.constant 3.200000e+01 : f32
    %27 = vector.broadcast %cst_17 : f32 to vector<16x1xf32>
    %28 = arith.divf %26, %27 : vector<16x1xf32>
    %29 = vector.broadcast %21 : vector<16x1xf32> to vector<16x32xf32>
    %30 = arith.subf %11, %29 : vector<16x32xf32>
    %cst_18 = arith.constant 9.99999974E-6 : f32
    %31 = vector.broadcast %cst_18 : f32 to vector<16x1xf32>
    %32 = arith.addf %28, %31 : vector<16x1xf32>
    %33 = math.rsqrt %32 : vector<16x1xf32>
    %34 = vector.broadcast %33 : vector<16x1xf32> to vector<16x32xf32>
    %35 = arith.mulf %30, %34 : vector<16x32xf32>
    %36 = vector.broadcast %15 : vector<1x32xf32> to vector<16x32xf32>
    %37 = arith.mulf %35, %36 : vector<16x32xf32>
    %38 = vector.broadcast %17 : vector<1x32xf32> to vector<16x32xf32>
    %39 = arith.addf %37, %38 : vector<16x32xf32>
    %c0_19 = arith.constant 0 : index
    %c0_20 = arith.constant 0 : index
    %c0_21 = arith.constant 0 : index
    %40 = vector.load %arg4[%c0_19, %c0_20, %c0_21] : memref<2x32x96xf32, #tpu.memory_space<vmem>>, vector<1x32x96xf32>
    %41 = vector.shape_cast %40 : vector<1x32x96xf32> to vector<32x96xf32>
    %cst_22 = arith.constant dense<0.000000e+00> : vector<16x96xf32>
    %42 = tpu.matmul %39, %41, %cst_22 {dimension_numbers = #tpu.dot_dimension_numbers<[1], [0], [0], [1], [0, 0, 1, 1], [], []>} : vector<16x32xf32>, vector<32x96xf32>, vector<16x96xf32> -> vector<16x96xf32>
    %c0_23 = arith.constant 0 : index
    %c0_24 = arith.constant 0 : index
    %c0_25 = arith.constant 0 : index
    %43 = vector.load %arg5[%c0_23, %c0_24, %c0_25] : memref<2x1x96xf32, #tpu.memory_space<vmem>>, vector<1x1x96xf32>
    %44 = vector.shape_cast %43 : vector<1x1x96xf32> to vector<1x96xf32>
    %45 = vector.broadcast %44 : vector<1x96xf32> to vector<16x96xf32>
    %46 = arith.addf %42, %45 : vector<16x96xf32>
    %47 = vector.extract_strided_slice %46 {offsets = [0, 0], sizes = [16, 32], strides = [1, 1]} : vector<16x96xf32> to vector<16x32xf32>
    %48 = vector.extract_strided_slice %46 {offsets = [0, 32], sizes = [16, 32], strides = [1, 1]} : vector<16x96xf32> to vector<16x32xf32>
    %49 = vector.extract_strided_slice %46 {offsets = [0, 64], sizes = [16, 32], strides = [1, 1]} : vector<16x96xf32> to vector<16x32xf32>
    %50 = vector.extract_strided_slice %47 {offsets = [0, 0], sizes = [16, 8], strides = [1, 1]} : vector<16x32xf32> to vector<16x8xf32>
    %51 = vector.extract_strided_slice %48 {offsets = [0, 0], sizes = [16, 8], strides = [1, 1]} : vector<16x32xf32> to vector<16x8xf32>
    %52 = tpu.transpose %51, [1, 0] : vector<16x8xf32> -> vector<8x16xf32>
    %cst_26 = arith.constant dense<0.000000e+00> : vector<16x16xf32>
    %53 = tpu.matmul %50, %52, %cst_26 {dimension_numbers = #tpu.dot_dimension_numbers<[1], [0], [0], [1], [0, 0, 1, 1], [], []>} : vector<16x8xf32>, vector<8x16xf32>, vector<16x16xf32> -> vector<16x16xf32>
    %54 = vector.extract_strided_slice %47 {offsets = [0, 8], sizes = [16, 8], strides = [1, 1]} : vector<16x32xf32> to vector<16x8xf32>
    %55 = vector.extract_strided_slice %48 {offsets = [0, 8], sizes = [16, 8], strides = [1, 1]} : vector<16x32xf32> to vector<16x8xf32>
    %56 = tpu.transpose %55, [1, 0] : vector<16x8xf32> -> vector<8x16xf32>
    %cst_27 = arith.constant dense<0.000000e+00> : vector<16x16xf32>
    %57 = tpu.matmul %54, %56, %cst_27 {dimension_numbers = #tpu.dot_dimension_numbers<[1], [0], [0], [1], [0, 0, 1, 1], [], []>} : vector<16x8xf32>, vector<8x16xf32>, vector<16x16xf32> -> vector<16x16xf32>
    %58 = vector.extract_strided_slice %47 {offsets = [0, 16], sizes = [16, 8], strides = [1, 1]} : vector<16x32xf32> to vector<16x8xf32>
    %59 = vector.extract_strided_slice %48 {offsets = [0, 16], sizes = [16, 8], strides = [1, 1]} : vector<16x32xf32> to vector<16x8xf32>
    %60 = tpu.transpose %59, [1, 0] : vector<16x8xf32> -> vector<8x16xf32>
    %cst_28 = arith.constant dense<0.000000e+00> : vector<16x16xf32>
    %61 = tpu.matmul %58, %60, %cst_28 {dimension_numbers = #tpu.dot_dimension_numbers<[1], [0], [0], [1], [0, 0, 1, 1], [], []>} : vector<16x8xf32>, vector<8x16xf32>, vector<16x16xf32> -> vector<16x16xf32>
    %62 = vector.extract_strided_slice %47 {offsets = [0, 24], sizes = [16, 8], strides = [1, 1]} : vector<16x32xf32> to vector<16x8xf32>
    %63 = vector.extract_strided_slice %48 {offsets = [0, 24], sizes = [16, 8], strides = [1, 1]} : vector<16x32xf32> to vector<16x8xf32>
    %64 = tpu.transpose %63, [1, 0] : vector<16x8xf32> -> vector<8x16xf32>
    %cst_29 = arith.constant dense<0.000000e+00> : vector<16x16xf32>
    %65 = tpu.matmul %62, %64, %cst_29 {dimension_numbers = #tpu.dot_dimension_numbers<[1], [0], [0], [1], [0, 0, 1, 1], [], []>} : vector<16x8xf32>, vector<8x16xf32>, vector<16x16xf32> -> vector<16x16xf32>
    %66 = tpu.concatenate %53, %57, %61, %65 in 0 : vector<16x16xf32>, vector<16x16xf32>, vector<16x16xf32>, vector<16x16xf32> -> vector<64x16xf32>
    %cst_30 = arith.constant 0.353553385 : f32
    %67 = vector.broadcast %cst_30 : f32 to vector<64x16xf32>
    %68 = arith.mulf %66, %67 : vector<64x16xf32>
    %69 = arith.addf %68, %13 : vector<64x16xf32>
    %cst_31 = arith.constant dense<0xFF800000> : vector<64xf32>
    %70 = vector.multi_reduction <maximumf>, %69, %cst_31 [1] : vector<64x16xf32> to vector<64xf32>
    %71 = vector.shape_cast %70 : vector<64xf32> to vector<64x1xf32>
    %72 = vector.broadcast %71 : vector<64x1xf32> to vector<64x16xf32>
    %73 = arith.subf %69, %72 : vector<64x16xf32>
    %74 = math.exp %73 : vector<64x16xf32>
    %cst_32 = arith.constant dense<0.000000e+00> : vector<64xf32>
    %75 = vector.multi_reduction <add>, %74, %cst_32 [1] : vector<64x16xf32> to vector<64xf32>
    %76 = vector.shape_cast %75 : vector<64xf32> to vector<64x1xf32>
    %77 = tpu.reciprocal %76 {approx = true} : vector<64x1xf32> -> vector<64x1xf32>
    %78 = vector.broadcast %77 : vector<64x1xf32> to vector<64x16xf32>
    %79 = arith.mulf %74, %78 : vector<64x16xf32>
    %c0_33 = arith.constant 0 : index
    %c0_34 = arith.constant 0 : index
    %c0_35 = arith.constant 0 : index
    %80 = vector.load %arg7[%c0_33, %c0_34, %c0_35] : memref<2x1x32xf32, #tpu.memory_space<vmem>>, vector<1x1x32xf32>
    %81 = vector.shape_cast %80 : vector<1x1x32xf32> to vector<1x32xf32>
    %82 = vector.shape_cast %81 : vector<1x32xf32> to vector<1x32xf32>
    %83 = vector.broadcast %82 : vector<1x32xf32> to vector<16x32xf32>
    %84 = vector.extract_strided_slice %79 {offsets = [0, 0], sizes = [16, 16], strides = [1, 1]} : vector<64x16xf32> to vector<16x16xf32>
    %85 = vector.extract_strided_slice %49 {offsets = [0, 0], sizes = [16, 8], strides = [1, 1]} : vector<16x32xf32> to vector<16x8xf32>
    %cst_36 = arith.constant dense<0.000000e+00> : vector<16x8xf32>
    %86 = tpu.matmul %84, %85, %cst_36 {dimension_numbers = #tpu.dot_dimension_numbers<[1], [0], [0], [1], [0, 0, 1, 1], [], []>} : vector<16x16xf32>, vector<16x8xf32>, vector<16x8xf32> -> vector<16x8xf32>
    %c0_37 = arith.constant 0 : index
    %c0_38 = arith.constant 0 : index
    %c0_39 = arith.constant 0 : index
    %87 = vector.load %arg6[%c0_37, %c0_38, %c0_39] : memref<2x32x32xf32, #tpu.memory_space<vmem>>, vector<1x32x32xf32>
    %88 = vector.shape_cast %87 : vector<1x32x32xf32> to vector<32x32xf32>
    %89 = vector.extract_strided_slice %88 {offsets = [0, 0], sizes = [8, 32], strides = [1, 1]} : vector<32x32xf32> to vector<8x32xf32>
    %cst_40 = arith.constant dense<0.000000e+00> : vector<16x32xf32>
    %90 = tpu.matmul %86, %89, %cst_40 {dimension_numbers = #tpu.dot_dimension_numbers<[1], [0], [0], [1], [0, 0, 1, 1], [], []>} : vector<16x8xf32>, vector<8x32xf32>, vector<16x32xf32> -> vector<16x32xf32>
    %91 = arith.addf %83, %90 : vector<16x32xf32>
    %92 = vector.extract_strided_slice %79 {offsets = [16, 0], sizes = [16, 16], strides = [1, 1]} : vector<64x16xf32> to vector<16x16xf32>
    %93 = vector.extract_strided_slice %49 {offsets = [0, 8], sizes = [16, 8], strides = [1, 1]} : vector<16x32xf32> to vector<16x8xf32>
    %cst_41 = arith.constant dense<0.000000e+00> : vector<16x8xf32>
    %94 = tpu.matmul %92, %93, %cst_41 {dimension_numbers = #tpu.dot_dimension_numbers<[1], [0], [0], [1], [0, 0, 1, 1], [], []>} : vector<16x16xf32>, vector<16x8xf32>, vector<16x8xf32> -> vector<16x8xf32>
    %c0_42 = arith.constant 0 : index
    %c0_43 = arith.constant 0 : index
    %c0_44 = arith.constant 0 : index
    %95 = vector.load %arg6[%c0_42, %c0_43, %c0_44] : memref<2x32x32xf32, #tpu.memory_space<vmem>>, vector<1x32x32xf32>
    %96 = vector.shape_cast %95 : vector<1x32x32xf32> to vector<32x32xf32>
    %97 = vector.extract_strided_slice %96 {offsets = [8, 0], sizes = [8, 32], strides = [1, 1]} : vector<32x32xf32> to vector<8x32xf32>
    %cst_45 = arith.constant dense<0.000000e+00> : vector<16x32xf32>
    %98 = tpu.matmul %94, %97, %cst_45 {dimension_numbers = #tpu.dot_dimension_numbers<[1], [0], [0], [1], [0, 0, 1, 1], [], []>} : vector<16x8xf32>, vector<8x32xf32>, vector<16x32xf32> -> vector<16x32xf32>
    %99 = arith.addf %91, %98 : vector<16x32xf32>
    %100 = vector.extract_strided_slice %79 {offsets = [32, 0], sizes = [16, 16], strides = [1, 1]} : vector<64x16xf32> to vector<16x16xf32>
    %101 = vector.extract_strided_slice %49 {offsets = [0, 16], sizes = [16, 8], strides = [1, 1]} : vector<16x32xf32> to vector<16x8xf32>
    %cst_46 = arith.constant dense<0.000000e+00> : vector<16x8xf32>
    %102 = tpu.matmul %100, %101, %cst_46 {dimension_numbers = #tpu.dot_dimension_numbers<[1], [0], [0], [1], [0, 0, 1, 1], [], []>} : vector<16x16xf32>, vector<16x8xf32>, vector<16x8xf32> -> vector<16x8xf32>
    %c0_47 = arith.constant 0 : index
    %c0_48 = arith.constant 0 : index
    %c0_49 = arith.constant 0 : index
    %103 = vector.load %arg6[%c0_47, %c0_48, %c0_49] : memref<2x32x32xf32, #tpu.memory_space<vmem>>, vector<1x32x32xf32>
    %104 = vector.shape_cast %103 : vector<1x32x32xf32> to vector<32x32xf32>
    %105 = vector.extract_strided_slice %104 {offsets = [16, 0], sizes = [8, 32], strides = [1, 1]} : vector<32x32xf32> to vector<8x32xf32>
    %cst_50 = arith.constant dense<0.000000e+00> : vector<16x32xf32>
    %106 = tpu.matmul %102, %105, %cst_50 {dimension_numbers = #tpu.dot_dimension_numbers<[1], [0], [0], [1], [0, 0, 1, 1], [], []>} : vector<16x8xf32>, vector<8x32xf32>, vector<16x32xf32> -> vector<16x32xf32>
    %107 = arith.addf %99, %106 : vector<16x32xf32>
    %108 = vector.extract_strided_slice %79 {offsets = [48, 0], sizes = [16, 16], strides = [1, 1]} : vector<64x16xf32> to vector<16x16xf32>
    %109 = vector.extract_strided_slice %49 {offsets = [0, 24], sizes = [16, 8], strides = [1, 1]} : vector<16x32xf32> to vector<16x8xf32>
    %cst_51 = arith.constant dense<0.000000e+00> : vector<16x8xf32>
    %110 = tpu.matmul %108, %109, %cst_51 {dimension_numbers = #tpu.dot_dimension_numbers<[1], [0], [0], [1], [0, 0, 1, 1], [], []>} : vector<16x16xf32>, vector<16x8xf32>, vector<16x8xf32> -> vector<16x8xf32>
    %c0_52 = arith.constant 0 : index
    %c0_53 = arith.constant 0 : index
    %c0_54 = arith.constant 0 : index
    %111 = vector.load %arg6[%c0_52, %c0_53, %c0_54] : memref<2x32x32xf32, #tpu.memory_space<vmem>>, vector<1x32x32xf32>
    %112 = vector.shape_cast %111 : vector<1x32x32xf32> to vector<32x32xf32>
    %113 = vector.extract_strided_slice %112 {offsets = [24, 0], sizes = [8, 32], strides = [1, 1]} : vector<32x32xf32> to vector<8x32xf32>
    %cst_55 = arith.constant dense<0.000000e+00> : vector<16x32xf32>
    %114 = tpu.matmul %110, %113, %cst_55 {dimension_numbers = #tpu.dot_dimension_numbers<[1], [0], [0], [1], [0, 0, 1, 1], [], []>} : vector<16x8xf32>, vector<8x32xf32>, vector<16x32xf32> -> vector<16x32xf32>
    %115 = arith.addf %107, %114 : vector<16x32xf32>
    %116 = arith.addf %11, %115 : vector<16x32xf32>
    %c0_56 = arith.constant 0 : index
    %c0_57 = arith.constant 0 : index
    %c0_58 = arith.constant 0 : index
    %117 = vector.load %arg10[%c0_56, %c0_57, %c0_58] : memref<2x1x32xf32, #tpu.memory_space<vmem>>, vector<1x1x32xf32>
    %118 = vector.shape_cast %117 : vector<1x1x32xf32> to vector<1x32xf32>
    %c0_59 = arith.constant 0 : index
    %c0_60 = arith.constant 0 : index
    %c0_61 = arith.constant 0 : index
    %119 = vector.load %arg11[%c0_59, %c0_60, %c0_61] : memref<2x1x32xf32, #tpu.memory_space<vmem>>, vector<1x1x32xf32>
    %120 = vector.shape_cast %119 : vector<1x1x32xf32> to vector<1x32xf32>
    %cst_62 = arith.constant dense<0.000000e+00> : vector<16xf32>
    %121 = vector.multi_reduction <add>, %116, %cst_62 [1] : vector<16x32xf32> to vector<16xf32>
    %122 = vector.shape_cast %121 : vector<16xf32> to vector<16x1xf32>
    %cst_63 = arith.constant 3.200000e+01 : f32
    %123 = vector.broadcast %cst_63 : f32 to vector<16x1xf32>
    %124 = arith.divf %122, %123 : vector<16x1xf32>
    %125 = vector.broadcast %124 : vector<16x1xf32> to vector<16x32xf32>
    %126 = arith.subf %116, %125 : vector<16x32xf32>
    %127 = arith.mulf %126, %126 : vector<16x32xf32>
    %cst_64 = arith.constant dense<0.000000e+00> : vector<16xf32>
    %128 = vector.multi_reduction <add>, %127, %cst_64 [1] : vector<16x32xf32> to vector<16xf32>
    %129 = vector.shape_cast %128 : vector<16xf32> to vector<16x1xf32>
    %cst_65 = arith.constant 3.200000e+01 : f32
    %130 = vector.broadcast %cst_65 : f32 to vector<16x1xf32>
    %131 = arith.divf %129, %130 : vector<16x1xf32>
    %132 = vector.broadcast %124 : vector<16x1xf32> to vector<16x32xf32>
    %133 = arith.subf %116, %132 : vector<16x32xf32>
    %cst_66 = arith.constant 9.99999974E-6 : f32
    %134 = vector.broadcast %cst_66 : f32 to vector<16x1xf32>
    %135 = arith.addf %131, %134 : vector<16x1xf32>
    %136 = math.rsqrt %135 : vector<16x1xf32>
    %137 = vector.broadcast %136 : vector<16x1xf32> to vector<16x32xf32>
    %138 = arith.mulf %133, %137 : vector<16x32xf32>
    %139 = vector.broadcast %118 : vector<1x32xf32> to vector<16x32xf32>
    %140 = arith.mulf %138, %139 : vector<16x32xf32>
    %141 = vector.broadcast %120 : vector<1x32xf32> to vector<16x32xf32>
    %142 = arith.addf %140, %141 : vector<16x32xf32>
    %c0_67 = arith.constant 0 : index
    %c0_68 = arith.constant 0 : index
    %c0_69 = arith.constant 0 : index
    %143 = vector.load %arg12[%c0_67, %c0_68, %c0_69] : memref<2x32x64xf32, #tpu.memory_space<vmem>>, vector<1x32x64xf32>
    %144 = vector.shape_cast %143 : vector<1x32x64xf32> to vector<32x64xf32>
    %cst_70 = arith.constant dense<0.000000e+00> : vector<16x64xf32>
    %145 = tpu.matmul %142, %144, %cst_70 {dimension_numbers = #tpu.dot_dimension_numbers<[1], [0], [0], [1], [0, 0, 1, 1], [], []>} : vector<16x32xf32>, vector<32x64xf32>, vector<16x64xf32> -> vector<16x64xf32>
    %c0_71 = arith.constant 0 : index
    %c0_72 = arith.constant 0 : index
    %c0_73 = arith.constant 0 : index
    %146 = vector.load %arg13[%c0_71, %c0_72, %c0_73] : memref<2x1x64xf32, #tpu.memory_space<vmem>>, vector<1x1x64xf32>
    %147 = vector.shape_cast %146 : vector<1x1x64xf32> to vector<1x64xf32>
    %148 = vector.broadcast %147 : vector<1x64xf32> to vector<16x64xf32>
    %149 = arith.addf %145, %148 : vector<16x64xf32>
    %cst_74 = arith.constant 0.000000e+00 : f32
    %150 = vector.broadcast %cst_74 : f32 to vector<16x64xf32>
    %151 = arith.maximumf %149, %150 : vector<16x64xf32>
    %c0_75 = arith.constant 0 : index
    %c0_76 = arith.constant 0 : index
    %c0_77 = arith.constant 0 : index
    %152 = vector.load %arg14[%c0_75, %c0_76, %c0_77] : memref<2x64x32xf32, #tpu.memory_space<vmem>>, vector<1x64x32xf32>
    %153 = vector.shape_cast %152 : vector<1x64x32xf32> to vector<64x32xf32>
    %cst_78 = arith.constant dense<0.000000e+00> : vector<16x32xf32>
    %154 = tpu.matmul %151, %153, %cst_78 {dimension_numbers = #tpu.dot_dimension_numbers<[1], [0], [0], [1], [0, 0, 1, 1], [], []>} : vector<16x64xf32>, vector<64x32xf32>, vector<16x32xf32> -> vector<16x32xf32>
    %155 = arith.addf %116, %154 : vector<16x32xf32>
    %c0_79 = arith.constant 0 : index
    %c0_80 = arith.constant 0 : index
    %c0_81 = arith.constant 0 : index
    %156 = vector.load %arg15[%c0_79, %c0_80, %c0_81] : memref<2x1x32xf32, #tpu.memory_space<vmem>>, vector<1x1x32xf32>
    %157 = vector.shape_cast %156 : vector<1x1x32xf32> to vector<1x32xf32>
    %158 = vector.broadcast %157 : vector<1x32xf32> to vector<16x32xf32>
    %159 = arith.addf %155, %158 : vector<16x32xf32>
    %c1 = arith.constant 1 : index
    %c0_82 = arith.constant 0 : index
    %c0_83 = arith.constant 0 : index
    %160 = vector.load %arg8[%c1, %c0_82, %c0_83] : memref<2x1x32xf32, #tpu.memory_space<vmem>>, vector<1x1x32xf32>
    %161 = vector.shape_cast %160 : vector<1x1x32xf32> to vector<1x32xf32>
    %c1_84 = arith.constant 1 : index
    %c0_85 = arith.constant 0 : index
    %c0_86 = arith.constant 0 : index
    %162 = vector.load %arg9[%c1_84, %c0_85, %c0_86] : memref<2x1x32xf32, #tpu.memory_space<vmem>>, vector<1x1x32xf32>
    %163 = vector.shape_cast %162 : vector<1x1x32xf32> to vector<1x32xf32>
    %cst_87 = arith.constant dense<0.000000e+00> : vector<16xf32>
    %164 = vector.multi_reduction <add>, %159, %cst_87 [1] : vector<16x32xf32> to vector<16xf32>
    %165 = vector.shape_cast %164 : vector<16xf32> to vector<16x1xf32>
    %cst_88 = arith.constant 3.200000e+01 : f32
    %166 = vector.broadcast %cst_88 : f32 to vector<16x1xf32>
    %167 = arith.divf %165, %166 : vector<16x1xf32>
    %168 = vector.broadcast %167 : vector<16x1xf32> to vector<16x32xf32>
    %169 = arith.subf %159, %168 : vector<16x32xf32>
    %170 = arith.mulf %169, %169 : vector<16x32xf32>
    %cst_89 = arith.constant dense<0.000000e+00> : vector<16xf32>
    %171 = vector.multi_reduction <add>, %170, %cst_89 [1] : vector<16x32xf32> to vector<16xf32>
    %172 = vector.shape_cast %171 : vector<16xf32> to vector<16x1xf32>
    %cst_90 = arith.constant 3.200000e+01 : f32
    %173 = vector.broadcast %cst_90 : f32 to vector<16x1xf32>
    %174 = arith.divf %172, %173 : vector<16x1xf32>
    %175 = vector.broadcast %167 : vector<16x1xf32> to vector<16x32xf32>
    %176 = arith.subf %159, %175 : vector<16x32xf32>
    %cst_91 = arith.constant 9.99999974E-6 : f32
    %177 = vector.broadcast %cst_91 : f32 to vector<16x1xf32>
    %178 = arith.addf %174, %177 : vector<16x1xf32>
    %179 = math.rsqrt %178 : vector<16x1xf32>
    %180 = vector.broadcast %179 : vector<16x1xf32> to vector<16x32xf32>
    %181 = arith.mulf %176, %180 : vector<16x32xf32>
    %182 = vector.broadcast %161 : vector<1x32xf32> to vector<16x32xf32>
    %183 = arith.mulf %181, %182 : vector<16x32xf32>
    %184 = vector.broadcast %163 : vector<1x32xf32> to vector<16x32xf32>
    %185 = arith.addf %183, %184 : vector<16x32xf32>
    %c1_92 = arith.constant 1 : index
    %c0_93 = arith.constant 0 : index
    %c0_94 = arith.constant 0 : index
    %186 = vector.load %arg4[%c1_92, %c0_93, %c0_94] : memref<2x32x96xf32, #tpu.memory_space<vmem>>, vector<1x32x96xf32>
    %187 = vector.shape_cast %186 : vector<1x32x96xf32> to vector<32x96xf32>
    %cst_95 = arith.constant dense<0.000000e+00> : vector<16x96xf32>
    %188 = tpu.matmul %185, %187, %cst_95 {dimension_numbers = #tpu.dot_dimension_numbers<[1], [0], [0], [1], [0, 0, 1, 1], [], []>} : vector<16x32xf32>, vector<32x96xf32>, vector<16x96xf32> -> vector<16x96xf32>
    %c1_96 = arith.constant 1 : index
    %c0_97 = arith.constant 0 : index
    %c0_98 = arith.constant 0 : index
    %189 = vector.load %arg5[%c1_96, %c0_97, %c0_98] : memref<2x1x96xf32, #tpu.memory_space<vmem>>, vector<1x1x96xf32>
    %190 = vector.shape_cast %189 : vector<1x1x96xf32> to vector<1x96xf32>
    %191 = vector.broadcast %190 : vector<1x96xf32> to vector<16x96xf32>
    %192 = arith.addf %188, %191 : vector<16x96xf32>
    %193 = vector.extract_strided_slice %192 {offsets = [0, 0], sizes = [16, 32], strides = [1, 1]} : vector<16x96xf32> to vector<16x32xf32>
    %194 = vector.extract_strided_slice %192 {offsets = [0, 32], sizes = [16, 32], strides = [1, 1]} : vector<16x96xf32> to vector<16x32xf32>
    %195 = vector.extract_strided_slice %192 {offsets = [0, 64], sizes = [16, 32], strides = [1, 1]} : vector<16x96xf32> to vector<16x32xf32>
    %196 = vector.extract_strided_slice %193 {offsets = [0, 0], sizes = [16, 8], strides = [1, 1]} : vector<16x32xf32> to vector<16x8xf32>
    %197 = vector.extract_strided_slice %194 {offsets = [0, 0], sizes = [16, 8], strides = [1, 1]} : vector<16x32xf32> to vector<16x8xf32>
    %198 = tpu.transpose %197, [1, 0] : vector<16x8xf32> -> vector<8x16xf32>
    %cst_99 = arith.constant dense<0.000000e+00> : vector<16x16xf32>
    %199 = tpu.matmul %196, %198, %cst_99 {dimension_numbers = #tpu.dot_dimension_numbers<[1], [0], [0], [1], [0, 0, 1, 1], [], []>} : vector<16x8xf32>, vector<8x16xf32>, vector<16x16xf32> -> vector<16x16xf32>
    %200 = vector.extract_strided_slice %193 {offsets = [0, 8], sizes = [16, 8], strides = [1, 1]} : vector<16x32xf32> to vector<16x8xf32>
    %201 = vector.extract_strided_slice %194 {offsets = [0, 8], sizes = [16, 8], strides = [1, 1]} : vector<16x32xf32> to vector<16x8xf32>
    %202 = tpu.transpose %201, [1, 0] : vector<16x8xf32> -> vector<8x16xf32>
    %cst_100 = arith.constant dense<0.000000e+00> : vector<16x16xf32>
    %203 = tpu.matmul %200, %202, %cst_100 {dimension_numbers = #tpu.dot_dimension_numbers<[1], [0], [0], [1], [0, 0, 1, 1], [], []>} : vector<16x8xf32>, vector<8x16xf32>, vector<16x16xf32> -> vector<16x16xf32>
    %204 = vector.extract_strided_slice %193 {offsets = [0, 16], sizes = [16, 8], strides = [1, 1]} : vector<16x32xf32> to vector<16x8xf32>
    %205 = vector.extract_strided_slice %194 {offsets = [0, 16], sizes = [16, 8], strides = [1, 1]} : vector<16x32xf32> to vector<16x8xf32>
    %206 = tpu.transpose %205, [1, 0] : vector<16x8xf32> -> vector<8x16xf32>
    %cst_101 = arith.constant dense<0.000000e+00> : vector<16x16xf32>
    %207 = tpu.matmul %204, %206, %cst_101 {dimension_numbers = #tpu.dot_dimension_numbers<[1], [0], [0], [1], [0, 0, 1, 1], [], []>} : vector<16x8xf32>, vector<8x16xf32>, vector<16x16xf32> -> vector<16x16xf32>
    %208 = vector.extract_strided_slice %193 {offsets = [0, 24], sizes = [16, 8], strides = [1, 1]} : vector<16x32xf32> to vector<16x8xf32>
    %209 = vector.extract_strided_slice %194 {offsets = [0, 24], sizes = [16, 8], strides = [1, 1]} : vector<16x32xf32> to vector<16x8xf32>
    %210 = tpu.transpose %209, [1, 0] : vector<16x8xf32> -> vector<8x16xf32>
    %cst_102 = arith.constant dense<0.000000e+00> : vector<16x16xf32>
    %211 = tpu.matmul %208, %210, %cst_102 {dimension_numbers = #tpu.dot_dimension_numbers<[1], [0], [0], [1], [0, 0, 1, 1], [], []>} : vector<16x8xf32>, vector<8x16xf32>, vector<16x16xf32> -> vector<16x16xf32>
    %212 = tpu.concatenate %199, %203, %207, %211 in 0 : vector<16x16xf32>, vector<16x16xf32>, vector<16x16xf32>, vector<16x16xf32> -> vector<64x16xf32>
    %cst_103 = arith.constant 0.353553385 : f32
    %213 = vector.broadcast %cst_103 : f32 to vector<64x16xf32>
    %214 = arith.mulf %212, %213 : vector<64x16xf32>
    %215 = arith.addf %214, %13 : vector<64x16xf32>
    %cst_104 = arith.constant dense<0xFF800000> : vector<64xf32>
    %216 = vector.multi_reduction <maximumf>, %215, %cst_104 [1] : vector<64x16xf32> to vector<64xf32>
    %217 = vector.shape_cast %216 : vector<64xf32> to vector<64x1xf32>
    %218 = vector.broadcast %217 : vector<64x1xf32> to vector<64x16xf32>
    %219 = arith.subf %215, %218 : vector<64x16xf32>
    %220 = math.exp %219 : vector<64x16xf32>
    %cst_105 = arith.constant dense<0.000000e+00> : vector<64xf32>
    %221 = vector.multi_reduction <add>, %220, %cst_105 [1] : vector<64x16xf32> to vector<64xf32>
    %222 = vector.shape_cast %221 : vector<64xf32> to vector<64x1xf32>
    %223 = tpu.reciprocal %222 {approx = true} : vector<64x1xf32> -> vector<64x1xf32>
    %224 = vector.broadcast %223 : vector<64x1xf32> to vector<64x16xf32>
    %225 = arith.mulf %220, %224 : vector<64x16xf32>
    %c1_106 = arith.constant 1 : index
    %c0_107 = arith.constant 0 : index
    %c0_108 = arith.constant 0 : index
    %226 = vector.load %arg7[%c1_106, %c0_107, %c0_108] : memref<2x1x32xf32, #tpu.memory_space<vmem>>, vector<1x1x32xf32>
    %227 = vector.shape_cast %226 : vector<1x1x32xf32> to vector<1x32xf32>
    %228 = vector.shape_cast %227 : vector<1x32xf32> to vector<1x32xf32>
    %229 = vector.broadcast %228 : vector<1x32xf32> to vector<16x32xf32>
    %230 = vector.extract_strided_slice %225 {offsets = [0, 0], sizes = [16, 16], strides = [1, 1]} : vector<64x16xf32> to vector<16x16xf32>
    %231 = vector.extract_strided_slice %195 {offsets = [0, 0], sizes = [16, 8], strides = [1, 1]} : vector<16x32xf32> to vector<16x8xf32>
    %cst_109 = arith.constant dense<0.000000e+00> : vector<16x8xf32>
    %232 = tpu.matmul %230, %231, %cst_109 {dimension_numbers = #tpu.dot_dimension_numbers<[1], [0], [0], [1], [0, 0, 1, 1], [], []>} : vector<16x16xf32>, vector<16x8xf32>, vector<16x8xf32> -> vector<16x8xf32>
    %c1_110 = arith.constant 1 : index
    %c0_111 = arith.constant 0 : index
    %c0_112 = arith.constant 0 : index
    %233 = vector.load %arg6[%c1_110, %c0_111, %c0_112] : memref<2x32x32xf32, #tpu.memory_space<vmem>>, vector<1x32x32xf32>
    %234 = vector.shape_cast %233 : vector<1x32x32xf32> to vector<32x32xf32>
    %235 = vector.extract_strided_slice %234 {offsets = [0, 0], sizes = [8, 32], strides = [1, 1]} : vector<32x32xf32> to vector<8x32xf32>
    %cst_113 = arith.constant dense<0.000000e+00> : vector<16x32xf32>
    %236 = tpu.matmul %232, %235, %cst_113 {dimension_numbers = #tpu.dot_dimension_numbers<[1], [0], [0], [1], [0, 0, 1, 1], [], []>} : vector<16x8xf32>, vector<8x32xf32>, vector<16x32xf32> -> vector<16x32xf32>
    %237 = arith.addf %229, %236 : vector<16x32xf32>
    %238 = vector.extract_strided_slice %225 {offsets = [16, 0], sizes = [16, 16], strides = [1, 1]} : vector<64x16xf32> to vector<16x16xf32>
    %239 = vector.extract_strided_slice %195 {offsets = [0, 8], sizes = [16, 8], strides = [1, 1]} : vector<16x32xf32> to vector<16x8xf32>
    %cst_114 = arith.constant dense<0.000000e+00> : vector<16x8xf32>
    %240 = tpu.matmul %238, %239, %cst_114 {dimension_numbers = #tpu.dot_dimension_numbers<[1], [0], [0], [1], [0, 0, 1, 1], [], []>} : vector<16x16xf32>, vector<16x8xf32>, vector<16x8xf32> -> vector<16x8xf32>
    %c1_115 = arith.constant 1 : index
    %c0_116 = arith.constant 0 : index
    %c0_117 = arith.constant 0 : index
    %241 = vector.load %arg6[%c1_115, %c0_116, %c0_117] : memref<2x32x32xf32, #tpu.memory_space<vmem>>, vector<1x32x32xf32>
    %242 = vector.shape_cast %241 : vector<1x32x32xf32> to vector<32x32xf32>
    %243 = vector.extract_strided_slice %242 {offsets = [8, 0], sizes = [8, 32], strides = [1, 1]} : vector<32x32xf32> to vector<8x32xf32>
    %cst_118 = arith.constant dense<0.000000e+00> : vector<16x32xf32>
    %244 = tpu.matmul %240, %243, %cst_118 {dimension_numbers = #tpu.dot_dimension_numbers<[1], [0], [0], [1], [0, 0, 1, 1], [], []>} : vector<16x8xf32>, vector<8x32xf32>, vector<16x32xf32> -> vector<16x32xf32>
    %245 = arith.addf %237, %244 : vector<16x32xf32>
    %246 = vector.extract_strided_slice %225 {offsets = [32, 0], sizes = [16, 16], strides = [1, 1]} : vector<64x16xf32> to vector<16x16xf32>
    %247 = vector.extract_strided_slice %195 {offsets = [0, 16], sizes = [16, 8], strides = [1, 1]} : vector<16x32xf32> to vector<16x8xf32>
    %cst_119 = arith.constant dense<0.000000e+00> : vector<16x8xf32>
    %248 = tpu.matmul %246, %247, %cst_119 {dimension_numbers = #tpu.dot_dimension_numbers<[1], [0], [0], [1], [0, 0, 1, 1], [], []>} : vector<16x16xf32>, vector<16x8xf32>, vector<16x8xf32> -> vector<16x8xf32>
    %c1_120 = arith.constant 1 : index
    %c0_121 = arith.constant 0 : index
    %c0_122 = arith.constant 0 : index
    %249 = vector.load %arg6[%c1_120, %c0_121, %c0_122] : memref<2x32x32xf32, #tpu.memory_space<vmem>>, vector<1x32x32xf32>
    %250 = vector.shape_cast %249 : vector<1x32x32xf32> to vector<32x32xf32>
    %251 = vector.extract_strided_slice %250 {offsets = [16, 0], sizes = [8, 32], strides = [1, 1]} : vector<32x32xf32> to vector<8x32xf32>
    %cst_123 = arith.constant dense<0.000000e+00> : vector<16x32xf32>
    %252 = tpu.matmul %248, %251, %cst_123 {dimension_numbers = #tpu.dot_dimension_numbers<[1], [0], [0], [1], [0, 0, 1, 1], [], []>} : vector<16x8xf32>, vector<8x32xf32>, vector<16x32xf32> -> vector<16x32xf32>
    %253 = arith.addf %245, %252 : vector<16x32xf32>
    %254 = vector.extract_strided_slice %225 {offsets = [48, 0], sizes = [16, 16], strides = [1, 1]} : vector<64x16xf32> to vector<16x16xf32>
    %255 = vector.extract_strided_slice %195 {offsets = [0, 24], sizes = [16, 8], strides = [1, 1]} : vector<16x32xf32> to vector<16x8xf32>
    %cst_124 = arith.constant dense<0.000000e+00> : vector<16x8xf32>
    %256 = tpu.matmul %254, %255, %cst_124 {dimension_numbers = #tpu.dot_dimension_numbers<[1], [0], [0], [1], [0, 0, 1, 1], [], []>} : vector<16x16xf32>, vector<16x8xf32>, vector<16x8xf32> -> vector<16x8xf32>
    %c1_125 = arith.constant 1 : index
    %c0_126 = arith.constant 0 : index
    %c0_127 = arith.constant 0 : index
    %257 = vector.load %arg6[%c1_125, %c0_126, %c0_127] : memref<2x32x32xf32, #tpu.memory_space<vmem>>, vector<1x32x32xf32>
    %258 = vector.shape_cast %257 : vector<1x32x32xf32> to vector<32x32xf32>
    %259 = vector.extract_strided_slice %258 {offsets = [24, 0], sizes = [8, 32], strides = [1, 1]} : vector<32x32xf32> to vector<8x32xf32>
    %cst_128 = arith.constant dense<0.000000e+00> : vector<16x32xf32>
    %260 = tpu.matmul %256, %259, %cst_128 {dimension_numbers = #tpu.dot_dimension_numbers<[1], [0], [0], [1], [0, 0, 1, 1], [], []>} : vector<16x8xf32>, vector<8x32xf32>, vector<16x32xf32> -> vector<16x32xf32>
    %261 = arith.addf %253, %260 : vector<16x32xf32>
    %262 = arith.addf %159, %261 : vector<16x32xf32>
    %c1_129 = arith.constant 1 : index
    %c0_130 = arith.constant 0 : index
    %c0_131 = arith.constant 0 : index
    %263 = vector.load %arg10[%c1_129, %c0_130, %c0_131] : memref<2x1x32xf32, #tpu.memory_space<vmem>>, vector<1x1x32xf32>
    %264 = vector.shape_cast %263 : vector<1x1x32xf32> to vector<1x32xf32>
    %c1_132 = arith.constant 1 : index
    %c0_133 = arith.constant 0 : index
    %c0_134 = arith.constant 0 : index
    %265 = vector.load %arg11[%c1_132, %c0_133, %c0_134] : memref<2x1x32xf32, #tpu.memory_space<vmem>>, vector<1x1x32xf32>
    %266 = vector.shape_cast %265 : vector<1x1x32xf32> to vector<1x32xf32>
    %cst_135 = arith.constant dense<0.000000e+00> : vector<16xf32>
    %267 = vector.multi_reduction <add>, %262, %cst_135 [1] : vector<16x32xf32> to vector<16xf32>
    %268 = vector.shape_cast %267 : vector<16xf32> to vector<16x1xf32>
    %cst_136 = arith.constant 3.200000e+01 : f32
    %269 = vector.broadcast %cst_136 : f32 to vector<16x1xf32>
    %270 = arith.divf %268, %269 : vector<16x1xf32>
    %271 = vector.broadcast %270 : vector<16x1xf32> to vector<16x32xf32>
    %272 = arith.subf %262, %271 : vector<16x32xf32>
    %273 = arith.mulf %272, %272 : vector<16x32xf32>
    %cst_137 = arith.constant dense<0.000000e+00> : vector<16xf32>
    %274 = vector.multi_reduction <add>, %273, %cst_137 [1] : vector<16x32xf32> to vector<16xf32>
    %275 = vector.shape_cast %274 : vector<16xf32> to vector<16x1xf32>
    %cst_138 = arith.constant 3.200000e+01 : f32
    %276 = vector.broadcast %cst_138 : f32 to vector<16x1xf32>
    %277 = arith.divf %275, %276 : vector<16x1xf32>
    %278 = vector.broadcast %270 : vector<16x1xf32> to vector<16x32xf32>
    %279 = arith.subf %262, %278 : vector<16x32xf32>
    %cst_139 = arith.constant 9.99999974E-6 : f32
    %280 = vector.broadcast %cst_139 : f32 to vector<16x1xf32>
    %281 = arith.addf %277, %280 : vector<16x1xf32>
    %282 = math.rsqrt %281 : vector<16x1xf32>
    %283 = vector.broadcast %282 : vector<16x1xf32> to vector<16x32xf32>
    %284 = arith.mulf %279, %283 : vector<16x32xf32>
    %285 = vector.broadcast %264 : vector<1x32xf32> to vector<16x32xf32>
    %286 = arith.mulf %284, %285 : vector<16x32xf32>
    %287 = vector.broadcast %266 : vector<1x32xf32> to vector<16x32xf32>
    %288 = arith.addf %286, %287 : vector<16x32xf32>
    %c1_140 = arith.constant 1 : index
    %c0_141 = arith.constant 0 : index
    %c0_142 = arith.constant 0 : index
    %289 = vector.load %arg12[%c1_140, %c0_141, %c0_142] : memref<2x32x64xf32, #tpu.memory_space<vmem>>, vector<1x32x64xf32>
    %290 = vector.shape_cast %289 : vector<1x32x64xf32> to vector<32x64xf32>
    %cst_143 = arith.constant dense<0.000000e+00> : vector<16x64xf32>
    %291 = tpu.matmul %288, %290, %cst_143 {dimension_numbers = #tpu.dot_dimension_numbers<[1], [0], [0], [1], [0, 0, 1, 1], [], []>} : vector<16x32xf32>, vector<32x64xf32>, vector<16x64xf32> -> vector<16x64xf32>
    %c1_144 = arith.constant 1 : index
    %c0_145 = arith.constant 0 : index
    %c0_146 = arith.constant 0 : index
    %292 = vector.load %arg13[%c1_144, %c0_145, %c0_146] : memref<2x1x64xf32, #tpu.memory_space<vmem>>, vector<1x1x64xf32>
    %293 = vector.shape_cast %292 : vector<1x1x64xf32> to vector<1x64xf32>
    %294 = vector.broadcast %293 : vector<1x64xf32> to vector<16x64xf32>
    %295 = arith.addf %291, %294 : vector<16x64xf32>
    %cst_147 = arith.constant 0.000000e+00 : f32
    %296 = vector.broadcast %cst_147 : f32 to vector<16x64xf32>
    %297 = arith.maximumf %295, %296 : vector<16x64xf32>
    %c1_148 = arith.constant 1 : index
    %c0_149 = arith.constant 0 : index
    %c0_150 = arith.constant 0 : index
    %298 = vector.load %arg14[%c1_148, %c0_149, %c0_150] : memref<2x64x32xf32, #tpu.memory_space<vmem>>, vector<1x64x32xf32>
    %299 = vector.shape_cast %298 : vector<1x64x32xf32> to vector<64x32xf32>
    %cst_151 = arith.constant dense<0.000000e+00> : vector<16x32xf32>
    %300 = tpu.matmul %297, %299, %cst_151 {dimension_numbers = #tpu.dot_dimension_numbers<[1], [0], [0], [1], [0, 0, 1, 1], [], []>} : vector<16x64xf32>, vector<64x32xf32>, vector<16x32xf32> -> vector<16x32xf32>
    %301 = arith.addf %262, %300 : vector<16x32xf32>
    %c1_152 = arith.constant 1 : index
    %c0_153 = arith.constant 0 : index
    %c0_154 = arith.constant 0 : index
    %302 = vector.load %arg15[%c1_152, %c0_153, %c0_154] : memref<2x1x32xf32, #tpu.memory_space<vmem>>, vector<1x1x32xf32>
    %303 = vector.shape_cast %302 : vector<1x1x32xf32> to vector<1x32xf32>
    %304 = vector.broadcast %303 : vector<1x32xf32> to vector<16x32xf32>
    %305 = arith.addf %301, %304 : vector<16x32xf32>
    %c0_155 = arith.constant 0 : index
    %c0_156 = arith.constant 0 : index
    %306 = vector.load %arg16[%c0_155, %c0_156] : memref<1x32xf32, #tpu.memory_space<vmem>>, vector<1x32xf32>
    %c0_157 = arith.constant 0 : index
    %c0_158 = arith.constant 0 : index
    %307 = vector.load %arg17[%c0_157, %c0_158] : memref<1x32xf32, #tpu.memory_space<vmem>>, vector<1x32xf32>
    %cst_159 = arith.constant dense<0.000000e+00> : vector<16xf32>
    %308 = vector.multi_reduction <add>, %305, %cst_159 [1] : vector<16x32xf32> to vector<16xf32>
    %309 = vector.shape_cast %308 : vector<16xf32> to vector<16x1xf32>
    %cst_160 = arith.constant 3.200000e+01 : f32
    %310 = vector.broadcast %cst_160 : f32 to vector<16x1xf32>
    %311 = arith.divf %309, %310 : vector<16x1xf32>
    %312 = vector.broadcast %311 : vector<16x1xf32> to vector<16x32xf32>
    %313 = arith.subf %305, %312 : vector<16x32xf32>
    %314 = arith.mulf %313, %313 : vector<16x32xf32>
    %cst_161 = arith.constant dense<0.000000e+00> : vector<16xf32>
    %315 = vector.multi_reduction <add>, %314, %cst_161 [1] : vector<16x32xf32> to vector<16xf32>
    %316 = vector.shape_cast %315 : vector<16xf32> to vector<16x1xf32>
    %cst_162 = arith.constant 3.200000e+01 : f32
    %317 = vector.broadcast %cst_162 : f32 to vector<16x1xf32>
    %318 = arith.divf %316, %317 : vector<16x1xf32>
    %319 = vector.broadcast %311 : vector<16x1xf32> to vector<16x32xf32>
    %320 = arith.subf %305, %319 : vector<16x32xf32>
    %cst_163 = arith.constant 9.99999974E-6 : f32
    %321 = vector.broadcast %cst_163 : f32 to vector<16x1xf32>
    %322 = arith.addf %318, %321 : vector<16x1xf32>
    %323 = math.rsqrt %322 : vector<16x1xf32>
    %324 = vector.broadcast %323 : vector<16x1xf32> to vector<16x32xf32>
    %325 = arith.mulf %320, %324 : vector<16x32xf32>
    %326 = vector.broadcast %306 : vector<1x32xf32> to vector<16x32xf32>
    %327 = arith.mulf %325, %326 : vector<16x32xf32>
    %328 = vector.broadcast %307 : vector<1x32xf32> to vector<16x32xf32>
    %329 = arith.addf %327, %328 : vector<16x32xf32>
    %c0_164 = arith.constant 0 : index
    %c0_165 = arith.constant 0 : index
    %330 = vector.load %arg18[%c0_164, %c0_165] : memref<16x32xf32, #tpu.memory_space<vmem>>, vector<16x32xf32>
    tpu.vector_store %arg18[%c0_164, %c0_165], %329 {strides = array<i32>} : memref<16x32xf32, #tpu.memory_space<vmem>>, vector<16x32xf32>,
    return
  }
}

</mosaic_0001>

<bundles_post_ra>
// kernel: tpu_custom_call.1
= control target key start
LH: loop header
LB: loop body
LE: loop exit
PB: predicated region body
PF: predicated region fallthrough
CT: control target
= control target key end

     0   :  { %s4830_s0 = inlined_call_operand.vmem [shape: s32[16,1], index: 0, kind: input, shape index: {}]   ;;  %s4831_s1 = inlined_call_operand.vmem [shape: f32[50,32], index: 1, kind: input, shape index: {}]   ;;  %s4832_s2 = inlined_call_operand.vmem [shape: f32[16,32], index: 2, kind: input, shape index: {}]   ;;  %s4833_s3 = inlined_call_operand.vmem [shape: f32[16,16], index: 3, kind: input, shape index: {}]   ;;  %s4834_s4 = inlined_call_operand.vmem [shape: f32[2,32,96], index: 4, kind: input, shape index: {}]   ;;  %s4835_s5 = inlined_call_operand.vmem [shape: f32[2,1,96], index: 5, kind: input, shape index: {}]   ;;  %s4836_s6 = inlined_call_operand.vmem [shape: f32[2,32,32], index: 6, kind: input, shape index: {}]   ;;  %s4837_s7 = inlined_call_operand.vmem [shape: f32[2,1,32], index: 7, kind: input, shape index: {}]   ;;  %s4838_s8 = inlined_call_operand.vmem [shape: f32[2,1,32], index: 8, kind: input, shape index: {}]   ;;  %s4839_s9 = inlined_call_operand.vmem [shape: f32[2,1,32], index: 9, kind: input, shape index: {}]   ;;  %s4840_s10 = inlined_call_operand.vmem [shape: f32[2,1,32], index: 10, kind: input, shape index: {}]   ;;  %s4841_s11 = inlined_call_operand.vmem [shape: f32[2,1,32], index: 11, kind: input, shape index: {}]   ;;  %s4842_s12 = inlined_call_operand.vmem [shape: f32[2,32,64], index: 12, kind: input, shape index: {}]   ;;  %s4843_s13 = inlined_call_operand.vmem [shape: f32[2,1,64], index: 13, kind: input, shape index: {}]   ;;  %s4844_s14 = inlined_call_operand.vmem [shape: f32[2,64,32], index: 14, kind: input, shape index: {}]   ;;  %s4845_s15 = inlined_call_operand.vmem [shape: f32[2,1,32], index: 15, kind: input, shape index: {}]   ;;  %s4846_s16 = inlined_call_operand.vmem [shape: f32[1,32], index: 16, kind: input, shape index: {}]   ;;  %s4847_s17 = inlined_call_operand.vmem [shape: f32[1,32], index: 17, kind: input, shape index: {}]   ;;  %s4848_s18 = inlined_call_operand.hbm [shape: f32[16,32], index: 18, kind: output, shape index: {}]  }
   0x1   :  { %4857 = sst [smem:[#allocation5_spill]] %s4830_s0 }
   0x2   :  { %4858 = sst [smem:[#allocation6_spill]] %s4831_s1 }
   0x3   :  { %4859 = sst [smem:[#allocation7_spill]] %s4832_s2 }
   0x4   :  { %4860 = sst [smem:[#allocation8_spill]] %s4843_s13 }
   0x5   :  { %s4861_s29 = sld [smem:[#allocation5_spill]]  ;;  %s4862_s13 = sld [smem:[#allocation6_spill]]  ;;  %v4218_v2 = vmov 0  }
   0x6   :  { %4029 = vset.pattern.permute.xlu0 %v4218_v2 }
   0xb   :  { %v60_v0 = vld [vmem:[%s4861_s29] sm:$0xff]  ;;  %v77_v3 = vld [vmem:[%s4862_s13 + $0x8] sm:$0xff]  ;;  %v78_v4 = vld [vmem:[%s4862_s13 + $0x10] sm:$0xff] }
   0xc   :  { %v76_v1 = vld [vmem:[%s4862_s13] sm:$0xff]  ;;  %v79_v5 = vld [vmem:[%s4862_s13 + $0x18] sm:$0xff]  ;;  %65 = vperm.xlu0 %4029, %v60_v0  }
   0xd   :  { %v3841_v6 = vpack.c.bf16 %v77_v3, %v76_v1  ;;  %v3845_v7 = vpack.c.bf16 %v79_v5, %v78_v4 }
   0xe   :  { %23 = vsyncpa [#allocation3], 0  ;;  %v61_v8 = vld [vmem:[%s4861_s29 + $0x8] sm:$0xff]  ;;  %v80_v9 = vld [vmem:[%s4862_s13 + $0x20] sm:$0xff]  ;;  %vm90_vm0 = vcmask 1041408   ;;  %v62_v13 = vlaneseq  ;;  %vm83_vm1 = vcmask 408576  }
   0xf   :  { %v81_v10 = vld [vmem:[%s4862_s13 + $0x28] sm:$0xff]  ;;  %3842 = vmatprep.subr.bf16.mxu0 %v3841_v6  ;;  %v82_v12 = vld [vmem:[%s4862_s13 + $0x30] sm:$0x3]  ;;  %v4219_v16 = vmov 0.0   ;;  %s4863_s19 = sld [smem:[#allocation7_spill]]  ;;  %vm179_vm4 = vcmask 261120  }
  0x10   :  { %3844 = vmatpush3.bf16.msra.mxu0 %v3841_v6  ;;  %68 = vperm.xlu0 %4029, %v61_v8   ;;  %v3849_v11 = vpack.c.bf16 %v81_v10, %v80_v9  ;;  %v63_v14 = vand.u32 127, %v62_v13  ;;  %v223_v40 = vld [vmem:[%s4834_s4] sm:$0xff]  ;;  %v224_v41 = vld [vmem:[%s4834_s4 + $0x8] sm:$0xff]  ;;  %v225_v42 = vld [vmem:[%s4834_s4 + $0x10] sm:$0xff]  ;;  %vm321_vm5 = vcmask 64512   ;;  %s4220_s1 = smov 120  }
  0x11   :  { %3846 = vmatprep.subr.bf16.mxu0 %v3845_v7  ;;  %v3853_v43 = vpack.c.bf16 %v224_v41, %v223_v40  ;;  %v226_v44 = vld [vmem:[%s4834_s4 + $0x18] sm:$0xff]  ;;  %v3327_v53 = vld [vmem:[%s4838_s8] ss:$0 sm:$0xff]  ;;  %s4221_s20 = smov 96   ;;  %s4222_s21 = smov 88   ;;  %vm4416_vm6 = vmpackc.low %vm321_vm5, %vm321_vm5  ;;  %vm694_vm7 = vcmask 130048  }
  0x12   :  { %v3857_v45 = vpack.c.bf16 %v226_v44, %v225_v42  ;;  %v3328_v55 = vld [vmem:[%s4839_s9] ss:$0 sm:$0xff]  ;;  %s4223_s22 = smov 80   ;;  %s4224_s2 = smov 72   ;;  %vm1622_vm8 = vcmask 523264  }
  0x13   :  { %3854 = vmatprep.subr.bf16.mxu1 %v3853_v43  ;;  %v3329_v62 = vld [vmem:[%s4835_s5] ss:$0 sm:$0xff]  ;;  %s4225_s23 = smov 112   ;;  %s4226_s24 = smov 104  }
  0x14   :  { %3848 = vmatpush3.bf16.msra.mxu0 %v3845_v7  ;;  %3856 = vmatpush3.bf16.msra.mxu1 %v3853_v43  ;;  %s4855_s30 = smov 48   ;;  %s4854_s0 = smov 40  }
  0x15   :  { %3850 = vmatprep.subr.bf16.mxu0 %v3849_v11  ;;  %v171_v22 = vld [vmem:[%s4863_s19] sm:$0xff]  ;;  %v172_v25 = vld [vmem:[%s4863_s19 + $0x8] sm:$0xff]  ;;  %3858 = vmatprep.subr.bf16.mxu1 %v3857_v45  ;;  %s4853_s29 = smov 56  }
  0x18   :  { %3852 = vmatpush3.bf16.msra.mxu0 %v3849_v11  ;;  %3860 = vmatpush3.bf16.msra.mxu1 %v3857_v45 }
  0x19   :  { %3602 = vmatprep.subr.msk.mxu0 %vm90_vm0, %v82_v12 }
  0x1c   :  { %3603 = vmatpush3.msk.msra.mxu0 %vm90_vm0, %v82_v12 }
  0x8b   :  { %v66_v15 = vpop.permute.xlu0 %65 }
  0x8c   :  { %vm70_vm2 = vcmp.eq.s32.totalorder %v66_v15, %v63_v14 }
  0x8d   :  { %v3322_v17 = vsel %vm70_vm2, 1.0, %v4219_v16 }
  0x8e   :  { %3604 = vmatprep.mubr.msk.f32.mxu0 %vm83_vm1, %v3322_v17 }
  0x8f   :  { %v69_v18 = vpop.permute.xlu0 %68 }
  0x90   :  { %vm71_vm3 = vcmp.eq.s32.totalorder %v69_v18, %v63_v14 }
  0x91   :  { %v3323_v19 = vsel %vm71_vm3, 1.0, %v4219_v16 }
  0x92   :  { %3605 = vmatmul.mubr.msk.f32.vlgmr.msra.gmra.mrb[0].mxu0 %vm83_vm1, %v3323_v19 }
 0x165   :  { %v3606_v20 = vpop.f32.mrb[0].mxu0 }
 0x166   :  { %v160_v21 = vpop.f32.mrb[1].mxu0  ;;  %v170_v23 = vmul.f32 5.656854, %v3606_v20 }
 0x167   :  { %v169_v24 = vmul.f32 5.656854, %v160_v21 }
 0x168   :  { %v4364_v27 = vadd.f32 %v172_v25, %v170_v23 }
 0x169   :  { %v4362_v26 = vadd.f32 %v171_v22, %v169_v24 }
 0x16a   :  { %v183_v29 = vsel %vm179_vm4, %v4364_v27, 0.0 }
 0x16b   :  { %v180_v28 = vsel %vm179_vm4, %v4362_v26, 0.0 }
 0x16c   :  { %181 = vadd.xlane.f32.xlu1 %v180_v28 }
 0x170   :  { %184 = vadd.xlane.f32.xlu1 %v183_v29 }
 0x1f9   :  { %v182_v30 = vpop.xlane.xlu1 %181 }
 0x1fa   :  { %v187_v31 = vmul.f32 0.03125, %v182_v30  ;;  %v4446_v30 = vld [vmem:[%s4833_s3 + $0x8] sm:$0xff] }
 0x1fc   :  { %v189_v32 = vsub.f32 %v4362_v26, %v187_v31 }
 0x1fd   :  { %v185_v33 = vpop.xlane.xlu1 %184 }
 0x1fe   :  { %v188_v34 = vmul.f32 0.03125, %v185_v33  ;;  %v191_v35 = vmul.f32 %v189_v32, %v189_v32  ;;  %v4451_v33 = vld [vmem:[%s4833_s3] sm:$0xff]  ;;  %s4856_s3 = smov 64  }
 0x200   :  { %v190_v36 = vsub.f32 %v4364_v27, %v188_v34  ;;  %v193_v37 = vsel %vm179_vm4, %v191_v35, 0.0 }
 0x201   :  { %194 = vadd.xlane.f32.xlu0 %v193_v37 }
 0x202   :  { %v192_v38 = vmul.f32 %v190_v36, %v190_v36 }
 0x204   :  { %v196_v39 = vsel %vm179_vm4, %v192_v38, 0.0 }
 0x205   :  { %197 = vadd.xlane.f32.xlu1 %v196_v39 }
 0x28e   :  { %v195_v46 = vpop.xlane.xlu0 %194 }
 0x28f   :  { %v199_v47 = vmul.f32 0.03125, %v195_v46 }
 0x291   :  { %v201_v48 = vadd.f32 1e-05, %v199_v47 }
 0x292   :  { %v198_v49 = vpop.xlane.xlu1 %197 }
 0x293   :  { %4110 = vrsqrt.f32 %v201_v48  ;;  %v200_v50 = vmul.f32 0.03125, %v198_v49 }
 0x295   :  { %v202_v51 = vadd.f32 1e-05, %v200_v50 }
 0x297   :  { %4112 = vrsqrt.f32 %v202_v51 }
 0x29d   :  { %v4111_v52 = vpop.eup %4110 }
 0x29e   :  { %v205_v54 = vmul.f32 %v4111_v52, %v189_v32 }
 0x2a0   :  { %v213_v56 = vmul.f32 %v3327_v53, %v205_v54 }
 0x2a1   :  { %v4113_v57 = vpop.eup %4112 }
 0x2a2   :  { %v206_v58 = vmul.f32 %v4113_v57, %v190_v36  ;;  %v221_v59 = vadd.f32 %v3328_v55, %v213_v56 }
 0x2a4   :  { %v214_v60 = vmul.f32 %v3327_v53, %v206_v58  ;;  %3615 = vmatprep.mubr.msk.f32.mxu1 %vm179_vm4, %v221_v59 }
 0x2a6   :  { %v222_v61 = vadd.f32 %v3328_v55, %v214_v60 }
 0x2a8   :  { %3616 = vmatmul.mubr.msk.f32.vlgmr.msra.gmra.mrb[0].mxu1 %vm179_vm4, %v222_v61 }
 0x37b   :  { %v3617_v63 = vpop.f32.mrb[0].mxu1 }
 0x37c   :  { %v312_v0 = vadd.f32 %v3617_v63, %v3329_v62  ;;  %v306_v1 = vpop.f32.mrb[1].mxu1 }
 0x37d   :  { %v307_v2 = vadd.f32 %v3329_v62, %v306_v1 }
 0x37e   :  { %407 = vrot.lane.b32.xlu0 %v312_v0, %s4220_s1 }
 0x37f   :  { %3622 = vmatprep.mubr.msk.f32.mxu1 %vm321_vm5, %v307_v2  ;;  %v4399_v3 = vpack.i.bf16 %v312_v0, %v307_v2 }
 0x381   :  { %4031 = vrot.lane.b32.xlu1 %v4399_v3, %s4221_s20 }
 0x385   :  { %4036 = vrot.lane.b32.xlu1 %v4399_v3, %s4222_s21 }
 0x389   :  { %4041 = vrot.lane.b32.xlu1 %v4399_v3, %s4223_s22 }
 0x38d   :  { %405 = vrot.lane.b32.xlu1 %v307_v2, %s4220_s1 }
 0x391   :  { %4046 = vrot.lane.b32.xlu1 %v4399_v3, %s4224_s2 }
 0x395   :  { %496 = vrot.lane.b32.xlu1 %v307_v2, %s4225_s23 }
 0x399   :  { %498 = vrot.lane.b32.xlu1 %v312_v0, %s4225_s23 }
 0x39d   :  { %587 = vrot.lane.b32.xlu1 %v307_v2, %s4226_s24 }
 0x3a1   :  { %589 = vrot.lane.b32.xlu1 %v312_v0, %s4226_s24 }
 0x3f0   :  { %v408_v18 = vpop.permute.xlu0 %407 }
 0x3f3   :  { %v4032_v4 = vpop.permute.xlu1 %4031 }
 0x3f4   :  { %v4034_v5 = vunpack.i.h.bf16 %v4032_v4  ;;  %v4033_v6 = vunpack.i.l.bf16 %v4032_v4 }
 0x3f6   :  { %v3861_v8 = vpack.c.bf16 %v4034_v5, %v4033_v6 }
 0x3f7   :  { %v4037_v9 = vpop.permute.xlu1 %4036 }
 0x3f8   :  { %v4039_v10 = vunpack.i.h.bf16 %v4037_v9  ;;  %v4038_v11 = vunpack.i.l.bf16 %v4037_v9  ;;  %3863 = vmatprep.subr.msk.bf16.mxu1 %vm4416_vm6, %v3861_v8 }
 0x3f9   :  { %3866 = vmatpush3.bf16.xpose.msk.msra.mxu1 %vm4416_vm6, %v3861_v8 }
 0x3fa   :  { %v3867_v12 = vpack.c.bf16 %v4039_v10, %v4038_v11 }
 0x3fb   :  { %v4042_v13 = vpop.permute.xlu1 %4041 }
 0x3fc   :  { %v4044_v14 = vunpack.i.h.bf16 %v4042_v13  ;;  %v4043_v15 = vunpack.i.l.bf16 %v4042_v13  ;;  %3869 = vmatprep.subr.msk.bf16.mxu0 %vm4416_vm6, %v3867_v12 }
 0x3fd   :  { %3872 = vmatpush3.bf16.xpose.msk.msra.mxu0 %vm4416_vm6, %v3867_v12 }
 0x3fe   :  { %v3873_v16 = vpack.c.bf16 %v4044_v14, %v4043_v15 }
 0x3ff   :  { %v406_v17 = vpop.permute.xlu1 %405 }
 0x400   :  { %3623 = vmatmul.mubr.msk.f32.vlgmr.msra.gmra.mrb[2].mxu1 %vm321_vm5, %v312_v0  ;;  %3629 = vmatprep.mubr.msk.f32.mxu0 %vm321_vm5, %v406_v17 }
 0x401   :  { %3875 = vmatprep.subr.msk.bf16.mxu1 %vm4416_vm6, %v3873_v16 }
 0x402   :  { %3878 = vmatpush3.bf16.xpose.msk.msra.mxu1 %vm4416_vm6, %v3873_v16 }
 0x403   :  { %v4047_v19 = vpop.permute.xlu1 %4046 }
 0x404   :  { %v4049_v20 = vunpack.i.h.bf16 %v4047_v19  ;;  %v4048_v21 = vunpack.i.l.bf16 %v4047_v19  ;;  %3630 = vmatmul.mubr.msk.f32.vlgmr.msra.gmra.mrb[2].mxu0 %vm321_vm5, %v408_v18 }
 0x406   :  { %v3879_v22 = vpack.c.bf16 %v4049_v20, %v4048_v21 }
 0x407   :  { %v497_v23 = vpop.permute.xlu1 %496 }
 0x408   :  { %3636 = vmatprep.mubr.msk.f32.mxu1 %vm321_vm5, %v497_v23  ;;  %3881 = vmatprep.subr.msk.bf16.mxu0 %vm4416_vm6, %v3879_v22 }
 0x409   :  { %3884 = vmatpush3.bf16.xpose.msk.msra.mxu0 %vm4416_vm6, %v3879_v22 }
 0x40b   :  { %v499_v24 = vpop.permute.xlu1 %498 }
 0x40c   :  { %3637 = vmatmul.mubr.msk.f32.vlgmr.msra.gmra.mrb[4].mxu1 %vm321_vm5, %v499_v24 }
 0x40f   :  { %v588_v25 = vpop.permute.xlu1 %587 }
 0x410   :  { %3643 = vmatprep.mubr.msk.f32.mxu0 %vm321_vm5, %v588_v25 }
 0x413   :  { %v590_v28 = vpop.permute.xlu1 %589 }
 0x414   :  { %3644 = vmatmul.mubr.msk.f32.vlgmr.msra.gmra.mrb[4].mxu0 %vm321_vm5, %v590_v28 }
 0x4d3   :  { %v3624_v29 = vpop.f32.mrb[2].mxu1 }
 0x4d4   :  { %v679_v31 = vmul.f32 0.35355338, %v3624_v29  ;;  %v396_v32 = vpop.f32.mrb[3].mxu1 }
 0x4d5   :  { %v678_v34 = vmul.f32 0.35355338, %v396_v32 }
 0x4d6   :  { %v687_v35 = vadd.f32 %v679_v31, %v4446_v30 }
 0x4d7   :  { %v3631_v36 = vpop.f32.mrb[2].mxu0  ;;  %v686_v37 = vadd.f32 %v678_v34, %v4451_v33 }
 0x4d8   :  { %v487_v38 = vpop.f32.mrb[3].mxu0  ;;  %v698_v39 = vsel %vm694_vm7, %v687_v35, -inf  ;;  %v681_v40 = vmul.f32 0.35355338, %v3631_v36 }
 0x4d9   :  { %v680_v41 = vmul.f32 0.35355338, %v487_v38  ;;  %699 = vmax.xlane.f32.xlu1 %v698_v39  ;;  %v695_v42 = vsel %vm694_vm7, %v686_v37, -inf }
 0x4da   :  { %696 = vmax.xlane.f32.xlu0 %v695_v42  ;;  %v689_v45 = vadd.f32 %v681_v40, %v4446_v30 }
 0x4db   :  { %v688_v43 = vadd.f32 %v680_v41, %v4451_v33 }
 0x4dc   :  { %v704_v50 = vsel %vm694_vm7, %v689_v45, -inf }
 0x4dd   :  { %v701_v44 = vsel %vm694_vm7, %v688_v43, -inf }
 0x4de   :  { %702 = vmax.xlane.f32.xlu0 %v701_v44 }
 0x4df   :  { %v3638_v46 = vpop.f32.mrb[4].mxu1 }
 0x4e0   :  { %v683_v47 = vmul.f32 0.35355338, %v3638_v46  ;;  %v578_v48 = vpop.f32.mrb[5].mxu1 }
 0x4e1   :  { %v682_v49 = vmul.f32 0.35355338, %v578_v48 }
 0x4e2   :  { %705 = vmax.xlane.f32.xlu0 %v704_v50  ;;  %v691_v51 = vadd.f32 %v683_v47, %v4446_v30 }
 0x4e3   :  { %v690_v52 = vadd.f32 %v682_v49, %v4451_v33 }
 0x4e4   :  { %v710_v53 = vsel %vm694_vm7, %v691_v51, -inf }
 0x4e5   :  { %v707_v54 = vsel %vm694_vm7, %v690_v52, -inf }
 0x4e6   :  { %711 = vmax.xlane.f32.xlu0 %v710_v53  ;;  %708 = vmax.xlane.f32.xlu1 %v707_v54 }
 0x4e7   :  { %v3645_v55 = vpop.f32.mrb[4].mxu0 }
 0x4e8   :  { %v685_v56 = vmul.f32 0.35355338, %v3645_v55  ;;  %v669_v57 = vpop.f32.mrb[5].mxu0 }
 0x4e9   :  { %v684_v58 = vmul.f32 0.35355338, %v669_v57 }
 0x4ea   :  { %v693_v59 = vadd.f32 %v685_v56, %v4446_v30 }
 0x4eb   :  { %v692_v60 = vadd.f32 %v684_v58, %v4451_v33 }
 0x4ec   :  { %v716_v61 = vsel %vm694_vm7, %v693_v59, -inf }
 0x4ed   :  { %717 = vmax.xlane.f32.xlu0 %v716_v61  ;;  %v713_v62 = vsel %vm694_vm7, %v692_v60, -inf }
 0x4ee   :  { %714 = vmax.xlane.f32.xlu1 %v713_v62 }
 0x4ff   :  { %4051 = vrot.lane.b32.xlu1 %v4399_v3, %s4856_s3  ;;  %s4866_s3 = sld [smem:[#allocation8_spill]] }
 0x566   :  { %v700_v63 = vpop.xlane.xlu1 %699 }
 0x567   :  { %v720_v0 = vsub.f32 %v687_v35, %v700_v63  ;;  %v697_v1 = vpop.xlane.xlu0 %696 }
 0x568   :  { %v719_v2 = vsub.f32 %v686_v37, %v697_v1 }
 0x569   :  { %v729_v4 = vmul.f32 1.442695, %v720_v0 }
 0x56a   :  { %v727_v5 = vmul.f32 1.442695, %v719_v2 }
 0x56b   :  { %4114 = vpow2.f32 %v729_v4  ;;  %v703_v6 = vpop.xlane.xlu0 %702 }
 0x56c   :  { %4116 = vpow2.f32 %v727_v5  ;;  %v721_v8 = vsub.f32 %v688_v43, %v703_v6 }
 0x56e   :  { %v731_v9 = vmul.f32 1.442695, %v721_v8 }
 0x56f   :  { %v706_v10 = vpop.xlane.xlu0 %705 }
 0x570   :  { %4118 = vpow2.f32 %v731_v9  ;;  %v722_v11 = vsub.f32 %v689_v45, %v706_v10 }
 0x572   :  { %v733_v12 = vmul.f32 1.442695, %v722_v11 }
 0x573   :  { %v712_v13 = vpop.xlane.xlu0 %711  ;;  %v709_v14 = vpop.xlane.xlu1 %708 }
 0x574   :  { %4120 = vpow2.f32 %v733_v12  ;;  %v724_v15 = vsub.f32 %v691_v51, %v712_v13  ;;  %v723_v16 = vsub.f32 %v690_v52, %v709_v14 }
 0x575   :  { %v4115_v17 = vpop.eup %4114 }
 0x576   :  { %v4117_v18 = vpop.eup %4116  ;;  %v737_v19 = vmul.f32 1.442695, %v724_v15  ;;  %v735_v20 = vmul.f32 1.442695, %v723_v16  ;;  %v746_v21 = vsel %vm694_vm7, %v4115_v17, 0.0 }
 0x577   :  { %747 = vadd.xlane.f32.xlu0 %v746_v21  ;;  %v743_v22 = vsel %vm694_vm7, %v4117_v18, 0.0 }
 0x578   :  { %4122 = vpow2.f32 %v737_v19  ;;  %744 = vadd.xlane.f32.xlu1 %v743_v22  ;;  %v877_v22 = vld [vmem:[%s4836_s6] sm:$0xff] }
 0x579   :  { %4124 = vpow2.f32 %v735_v20  ;;  %3653 = vmatprep.subr.mxu1 %v877_v22 }
 0x57a   :  { %v4119_v23 = vpop.eup %4118  ;;  %v718_v24 = vpop.xlane.xlu0 %717  ;;  %3654 = vmatpush3.msra.mxu1 %v877_v22 }
 0x57b   :  { %v726_v25 = vsub.f32 %v693_v59, %v718_v24  ;;  %v715_v28 = vpop.xlane.xlu1 %714  ;;  %v749_v29 = vsel %vm694_vm7, %v4119_v23, 0.0 }
 0x57c   :  { %v725_v31 = vsub.f32 %v692_v60, %v715_v28  ;;  %750 = vadd.xlane.f32.xlu1 %v749_v29  ;;  %v879_v28 = vld [vmem:[%s4836_s6 + $0x10] sm:$0xff] }
 0x57d   :  { %v741_v32 = vmul.f32 1.442695, %v726_v25 }
 0x57e   :  { %v4474_v34 = vpop.eup %4120  ;;  %v739_v35 = vmul.f32 1.442695, %v725_v31 }
 0x57f   :  { %4126 = vpow2.f32 %v741_v32  ;;  %v4052_v36 = vpop.permute.xlu1 %4051  ;;  %v752_v37 = vsel %vm694_vm7, %v4474_v34, 0.0  ;;  %v880_v32 = vld [vmem:[%s4836_s6 + $0x18] sm:$0xff] }
 0x580   :  { %v4054_v38 = vunpack.i.h.bf16 %v4052_v36  ;;  %v4053_v39 = vunpack.i.l.bf16 %v4052_v36  ;;  %753 = vadd.xlane.f32.xlu0 %v752_v37  ;;  %4128 = vpow2.f32 %v739_v35 }
 0x582   :  { %v4478_v40 = vpop.eup %4122  ;;  %v3885_v41 = vpack.c.bf16 %v4054_v38, %v4053_v39  ;;  %v3348_v38 = vld [vmem:[%s4837_s7] ss:$0 sm:$0xff] }
 0x583   :  { %v4125_v42 = vpop.eup %4124  ;;  %v758_v43 = vsel %vm694_vm7, %v4478_v40, 0.0 }
 0x584   :  { %759 = vadd.xlane.f32.xlu0 %v758_v43  ;;  %v755_v44 = vsel %vm694_vm7, %v4125_v42, 0.0  ;;  %3886 = vmatprep.subr.bf16.mxu0 %v3885_v41 }
 0x585   :  { %756 = vadd.xlane.f32.xlu1 %v755_v44  ;;  %3888 = vmatpush3.bf16.msra.mxu0 %v3885_v41 }
 0x589   :  { %v4483_v45 = vpop.eup %4126 }
 0x58a   :  { %v764_v46 = vsel %vm694_vm7, %v4483_v45, 0.0  ;;  %v4129_v47 = vpop.eup %4128 }
 0x58b   :  { %765 = vadd.xlane.f32.xlu0 %v764_v46  ;;  %v761_v48 = vsel %vm694_vm7, %v4129_v47, 0.0 }
 0x58f   :  { %762 = vadd.xlane.f32.xlu0 %v761_v48 }
 0x596   :  { %4061 = vrot.lane.b32.xlu1 %v4399_v3, %s4855_s30 }
 0x59a   :  { %4066 = vrot.lane.b32.xlu1 %v4399_v3, %s4854_s0 }
 0x5a5   :  { %4056 = vrot.lane.b32.xlu0 %v4399_v3, %s4853_s29 }
 0x604   :  { %v748_v49 = vpop.xlane.xlu0 %747 }
 0x605   :  { %4130 = vrcp.f32 %v748_v49  ;;  %v745_v50 = vpop.xlane.xlu1 %744 }
 0x606   :  { %4132 = vrcp.f32 %v745_v50 }
 0x609   :  { %v751_v51 = vpop.xlane.xlu1 %750 }
 0x60a   :  { %4134 = vrcp.f32 %v751_v51 }
 0x60d   :  { %v754_v52 = vpop.xlane.xlu0 %753 }
 0x60e   :  { %4136 = vrcp.f32 %v754_v52 }
 0x60f   :  { %v4131_v53 = vpop.eup %4130 }
 0x610   :  { %v4133_v54 = vpop.eup %4132  ;;  %v776_v56 = vmul.f32 %v4131_v53, %v4115_v17 }
 0x611   :  { %v775_v55 = vmul.f32 %v4133_v54, %v4117_v18  ;;  %v760_v58 = vpop.xlane.xlu0 %759 }
 0x612   :  { %v757_v60 = vpop.xlane.xlu1 %756 }
 0x613   :  { %3650 = vmatprep.mubr.msk.f32.mxu0 %vm694_vm7, %v775_v55  ;;  %4138 = vrcp.f32 %v757_v60  ;;  %v1520_v55 = vld [vmem:[%s4842_s12] sm:$0xff] }
 0x614   :  { %v4135_v57 = vpop.eup %4134  ;;  %3651 = vmatmul.mubr.msk.f32.vlgmr.msra.gmra.mrb[6].mxu0 %vm694_vm7, %v776_v56  ;;  %4140 = vrcp.f32 %v760_v58  ;;  %v1521_v56 = vld [vmem:[%s4842_s12 + $0x8] sm:$0xff]  ;;  %v1522_v58 = vld [vmem:[%s4842_s12 + $0x10] sm:$0xff] }
 0x615   :  { %v777_v59 = vmul.f32 %v4135_v57, %v4119_v23  ;;  %v878_v23 = vld [vmem:[%s4836_s6 + $0x8] sm:$0xff]  ;;  %v3901_v57 = vpack.c.bf16 %v1521_v56, %v1520_v55 }
 0x616   :  { %v4062_v61 = vpop.permute.xlu1 %4061  ;;  %3665 = vmatprep.subr.mxu1 %v878_v23  ;;  %v3378_v55 = vld [vmem:[%s4834_s4 + $0x28] sm:$0xff] }
 0x617   :  { %3662 = vmatprep.mubr.msk.f32.mxu0 %vm694_vm7, %v777_v59  ;;  %v4064_v0 = vunpack.i.h.bf16 %v4062_v61  ;;  %v4063_v1 = vunpack.i.l.bf16 %v4062_v61  ;;  %v1523_v59 = vld [vmem:[%s4842_s12 + $0x18] sm:$0xff]  ;;  %v1615_v61 = vld [vmem:[%s4844_s14 + $0x8] sm:$0xff] }
 0x618   :  { %v766_v3 = vpop.xlane.xlu0 %765  ;;  %v4137_v8 = vpop.eup %4136  ;;  %v3905_v60 = vpack.c.bf16 %v1523_v59, %v1522_v58  ;;  %v3380_v58 = vld [vmem:[%s4834_s4 + $0x38] sm:$0xff] }
 0x619   :  { %v3893_v10 = vpack.c.bf16 %v4064_v0, %v4063_v1  ;;  %v778_v13 = vmul.f32 %v4137_v8, %v4474_v34  ;;  %v1617_v0 = vld [vmem:[%s4844_s14 + $0x18] sm:$0xff] }
 0x61a   :  { %v4067_v5 = vpop.permute.xlu1 %4066 }
 0x61b   :  { %v4069_v11 = vunpack.i.h.bf16 %v4067_v5  ;;  %v4068_v12 = vunpack.i.l.bf16 %v4067_v5 }
 0x61c   :  { %v763_v62 = vpop.xlane.xlu0 %762 }
 0x61d   :  { %4142 = vrcp.f32 %v763_v62  ;;  %v4139_v9 = vpop.eup %4138  ;;  %v3897_v17 = vpack.c.bf16 %v4069_v11, %v4068_v12  ;;  %v1616_v62 = vld [vmem:[%s4844_s14 + $0x10] sm:$0xff] }
 0x61e   :  { %4144 = vrcp.f32 %v766_v3  ;;  %v4141_v14 = vpop.eup %4140  ;;  %v779_v15 = vmul.f32 %v4139_v9, %v4125_v42  ;;  %v1614_v3 = vld [vmem:[%s4844_s14] sm:$0xff]  ;;  %v3913_v1 = vpack.c.bf16 %v1617_v0, %v1616_v62 }
 0x61f   :  { %v780_v18 = vmul.f32 %v4141_v14, %v4478_v40  ;;  %v3365_v14 = vld [vmem:[%s4840_s10] ss:$0 sm:$0xff] }
 0x620   :  { %v4057_v63 = vpop.permute.xlu0 %4056 }
 0x621   :  { %v4059_v2 = vunpack.i.h.bf16 %v4057_v63  ;;  %v4058_v4 = vunpack.i.l.bf16 %v4057_v63  ;;  %v3909_v63 = vpack.c.bf16 %v1615_v61, %v1614_v3 }
 0x623   :  { %v3889_v6 = vpack.c.bf16 %v4059_v2, %v4058_v4  ;;  %v1618_v2 = vld [vmem:[%s4844_s14 + $0x20] sm:$0xff]  ;;  %v1619_v4 = vld [vmem:[%s4844_s14 + $0x28] sm:$0xff] }
 0x624   :  { %v3917_v5 = vpack.c.bf16 %v1619_v4, %v1618_v2  ;;  %v3375_v2 = vld [vmem:[%s4838_s8 + $0x1] ss:$0 sm:$0xff]  ;;  %s4868_s8 = smov 48  }
 0x625   :  { %3890 = vmatprep.subr.bf16.mxu0 %v3889_v6 }
 0x626   :  { %3892 = vmatpush3.bf16.msra.mxu0 %v3889_v6 }
 0x627   :  { %3894 = vmatprep.subr.bf16.mxu0 %v3893_v10  ;;  %v4143_v16 = vpop.eup %4142 }
 0x628   :  { %v4145_v19 = vpop.eup %4144  ;;  %v781_v20 = vmul.f32 %v4143_v16, %v4129_v47 }
 0x629   :  { %3663 = vmatmul.mubr.msk.f32.vlgmr.msra.gmra.mrb[8].mxu0 %vm694_vm7, %v778_v13  ;;  %v782_v21 = vmul.f32 %v4145_v19, %v4483_v45 }
 0x62a   :  { %3896 = vmatpush3.bf16.msra.mxu0 %v3893_v10  ;;  %3674 = vmatprep.mubr.msk.f32.mxu0 %vm694_vm7, %v779_v15 }
 0x62b   :  { %3898 = vmatprep.subr.bf16.mxu0 %v3897_v17 }
 0x62d   :  { %3675 = vmatmul.mubr.msk.f32.vlgmr.msra.gmra.mrb[10].mxu0 %vm694_vm7, %v780_v18  ;;  %v3366_v18 = vld [vmem:[%s4841_s11] ss:$0 sm:$0xff] }
 0x62e   :  { %3900 = vmatpush3.bf16.msra.mxu0 %v3897_v17  ;;  %3686 = vmatprep.mubr.msk.f32.mxu0 %vm694_vm7, %v781_v20 }
 0x62f   :  { %3902 = vmatprep.subr.bf16.mxu0 %v3901_v57 }
 0x631   :  { %3687 = vmatmul.mubr.msk.f32.vlgmr.msra.gmra.mrb[12].mxu0 %vm694_vm7, %v782_v21 }
 0x632   :  { %3904 = vmatpush3.bf16.msra.mxu0 %v3901_v57  ;;  %v3379_v57 = vld [vmem:[%s4834_s4 + $0x30] sm:$0xff] }
 0x633   :  { %3906 = vmatprep.subr.bf16.mxu0 %v3905_v60  ;;  %v3929_v59 = vpack.c.bf16 %v3380_v58, %v3379_v57 }
 0x636   :  { %3908 = vmatpush3.bf16.msra.mxu0 %v3905_v60 }
 0x6e7   :  { %v3652_v24 = vpop.f32.mrb[6].mxu0 }
 0x6e8   :  { %v868_v25 = vpop.f32.mrb[7].mxu0 }
 0x6e9   :  { %3655 = vmatprep.mubr.msk.f32.mxu1 %vm321_vm5, %v868_v25 }
 0x6ea   :  { %3656 = vmatmul.mubr.msk.f32.vlgmr.msra.gmra.mrb[6].mxu1 %vm321_vm5, %v3652_v24  ;;  %v1621_v24 = vld [vmem:[%s4844_s14 + $0x38] sm:$0xff] }
 0x6eb   :  { %3666 = vmatpush3.msra.mxu1 %v878_v23  ;;  %v1620_v23 = vld [vmem:[%s4844_s14 + $0x30] sm:$0xff] }
 0x6ec   :  { %3677 = vmatprep.subr.mxu1 %v879_v28  ;;  %v3921_v25 = vpack.c.bf16 %v1621_v24, %v1620_v23 }
 0x6fc   :  { %v3664_v29 = vpop.f32.mrb[8].mxu0 }
 0x6fd   :  { %v1042_v31 = vpop.f32.mrb[9].mxu0 }
 0x6fe   :  { %3667 = vmatprep.mubr.msk.f32.mxu1 %vm321_vm5, %v1042_v31 }
 0x6ff   :  { %3668 = vmatmul.mubr.msk.f32.vlgmr.msra.gmra.mrb[6].mxu1 %vm321_vm5, %v3664_v29 }
 0x700   :  { %v3676_v34 = vpop.f32.mrb[10].mxu0  ;;  %3678 = vmatpush3.msra.mxu1 %v879_v28  ;;  %v3367_v28 = vld [vmem:[%s4866_s3] ss:$0 sm:$0xff] }
 0x701   :  { %v1212_v35 = vpop.f32.mrb[11].mxu0  ;;  %3689 = vmatprep.subr.mxu1 %v880_v32 }
 0x702   :  { %3679 = vmatprep.mubr.msk.f32.mxu1 %vm321_vm5, %v1212_v35 }
 0x704   :  { %v3688_v36 = vpop.f32.mrb[12].mxu0 }
 0x705   :  { %v1382_v37 = vpop.f32.mrb[13].mxu0 }
 0x707   :  { %3680 = vmatmul.mubr.msk.f32.vlgmr.msra.gmra.mrb[6].mxu1 %vm321_vm5, %v3676_v34 }
 0x708   :  { %3690 = vmatpush3.msra.mxu1 %v880_v32  ;;  %3691 = vmatprep.mubr.msk.f32.mxu1 %vm321_vm5, %v1382_v37 }
 0x709   :  { %3910 = vmatprep.subr.bf16.mxu1 %v3909_v63 }
 0x70f   :  { %3692 = vmatmul.mubr.msk.f32.vlgmr.msra.gmra.mrb[6].mxu1 %vm321_vm5, %v3688_v36 }
 0x710   :  { %3912 = vmatpush3.bf16.msra.mxu1 %v3909_v63 }
 0x711   :  { %3914 = vmatprep.subr.bf16.mxu1 %v3913_v1 }
 0x714   :  { %3916 = vmatpush3.bf16.msra.mxu1 %v3913_v1 }
 0x715   :  { %3918 = vmatprep.subr.bf16.mxu1 %v3917_v5 }
 0x718   :  { %3920 = vmatpush3.bf16.msra.mxu1 %v3917_v5 }
 0x719   :  { %3922 = vmatprep.subr.bf16.mxu1 %v3921_v25 }
 0x71c   :  { %3924 = vmatpush3.bf16.msra.mxu1 %v3921_v25 }
 0x7e2   :  { %v3693_v39 = vpop.f32.mrb[6].mxu1 }
 0x7e3   :  { %v3997_v40 = vadd.f32 %v3693_v39, %v3348_v38  ;;  %v1463_v41 = vpop.f32.mrb[7].mxu1 }
 0x7e4   :  { %v3998_v42 = vadd.f32 %v3348_v38, %v1463_v41  ;;  %v3372_v38 = vld [vmem:[%s4845_s15] ss:$0 sm:$0xff] }
 0x7e5   :  { %v4529_v43 = vadd.f32 %v3997_v40, %v4364_v27 }
 0x7e6   :  { %v4532_v44 = vadd.f32 %v3998_v42, %v4362_v26 }
 0x7e7   :  { %v1481_v45 = vsel %vm179_vm4, %v4529_v43, 0.0 }
 0x7e8   :  { %1482 = vadd.xlane.f32.xlu0 %v1481_v45  ;;  %v1478_v46 = vsel %vm179_vm4, %v4532_v44, 0.0 }
 0x7e9   :  { %1479 = vadd.xlane.f32.xlu1 %v1478_v46 }
 0x875   :  { %v1483_v47 = vpop.xlane.xlu0 %1482 }
 0x876   :  { %v1485_v48 = vmul.f32 0.03125, %v1483_v47  ;;  %v1480_v49 = vpop.xlane.xlu1 %1479 }
 0x877   :  { %v1484_v50 = vmul.f32 0.03125, %v1480_v49 }
 0x878   :  { %v1487_v51 = vsub.f32 %v4529_v43, %v1485_v48 }
 0x879   :  { %v1486_v27 = vsub.f32 %v4532_v44, %v1484_v50 }
 0x87a   :  { %v1489_v52 = vmul.f32 %v1487_v51, %v1487_v51 }
 0x87b   :  { %v1488_v53 = vmul.f32 %v1486_v27, %v1486_v27 }
 0x87c   :  { %v1493_v26 = vsel %vm179_vm4, %v1489_v52, 0.0 }
 0x87d   :  { %1494 = vadd.xlane.f32.xlu0 %v1493_v26  ;;  %v1490_v54 = vsel %vm179_vm4, %v1488_v53, 0.0 }
 0x87e   :  { %1491 = vadd.xlane.f32.xlu1 %v1490_v54  ;;  %v3377_v54 = vld [vmem:[%s4834_s4 + $0x20] sm:$0xff] }
 0x87f   :  { %v3925_v56 = vpack.c.bf16 %v3378_v55, %v3377_v54 }
 0x881   :  { %3926 = vmatprep.subr.bf16.mxu0 %v3925_v56 }
 0x90a   :  { %v1495_v6 = vpop.xlane.xlu0 %1494 }
 0x90b   :  { %v1497_v8 = vmul.f32 0.03125, %v1495_v6  ;;  %v1492_v9 = vpop.xlane.xlu1 %1491 }
 0x90c   :  { %v1496_v10 = vmul.f32 0.03125, %v1492_v9 }
 0x90d   :  { %v1499_v11 = vadd.f32 1e-05, %v1497_v8  ;;  %v3376_v8 = vld [vmem:[%s4839_s9 + $0x1] ss:$0 sm:$0xff]  ;;  %s4869_s9 = smov 40  }
 0x90e   :  { %v1498_v12 = vadd.f32 1e-05, %v1496_v10 }
 0x90f   :  { %4146 = vrsqrt.f32 %v1499_v11 }
 0x910   :  { %4148 = vrsqrt.f32 %v1498_v12 }
 0x919   :  { %v4147_v13 = vpop.eup %4146 }
 0x91a   :  { %v4149_v15 = vpop.eup %4148  ;;  %v1503_v16 = vmul.f32 %v4147_v13, %v1487_v51  ;;  %v3382_v13 = vld [vmem:[%s4835_s5 + $0x1] ss:$0 sm:$0xff]  ;;  %s4867_s5 = smov 64  }
 0x91b   :  { %v1502_v17 = vmul.f32 %v4149_v15, %v1486_v27 }
 0x91c   :  { %v1511_v19 = vmul.f32 %v3365_v14, %v1503_v16 }
 0x91d   :  { %v1510_v20 = vmul.f32 %v3365_v14, %v1502_v17 }
 0x91e   :  { %v1519_v22 = vadd.f32 %v3366_v18, %v1511_v19 }
 0x91f   :  { %v1518_v21 = vadd.f32 %v3366_v18, %v1510_v20 }
 0x921   :  { %3702 = vmatprep.mubr.msk.f32.mxu0 %vm179_vm4, %v1518_v21 }
 0x922   :  { %3703 = vmatmul.mubr.msk.f32.vlgmr.msra.gmra.mrb[14].mxu0 %vm179_vm4, %v1519_v22 }
 0x923   :  { %3928 = vmatpush3.bf16.msra.mxu0 %v3925_v56 }
 0x924   :  { %3930 = vmatprep.subr.bf16.mxu0 %v3929_v59 }
 0x927   :  { %3932 = vmatpush3.bf16.msra.mxu0 %v3929_v59 }
 0x9f5   :  { %v3704_v29 = vpop.f32.mrb[14].mxu0 }
 0x9f6   :  { %v1609_v31 = vadd.f32 %v3704_v29, %v3367_v28  ;;  %v1603_v32 = vpop.f32.mrb[15].mxu0 }
 0x9f7   :  { %v1604_v34 = vadd.f32 %v3367_v28, %v1603_v32 }
 0x9f8   :  { %v1613_v36 = vmax.f32 %v1609_v31, 0.0 }
 0x9f9   :  { %v1612_v35 = vmax.f32 %v1604_v34, 0.0 }
 0x9fb   :  { %3721 = vmatprep.mubr.msk.f32.mxu1 %vm1622_vm8, %v1612_v35 }
 0x9fc   :  { %3722 = vmatmul.mubr.msk.f32.vlgmr.msra.gmra.mrb[8].mxu1 %vm1622_vm8, %v1613_v36 }
 0xacf   :  { %v3723_v37 = vpop.f32.mrb[8].mxu1 }
 0xad0   :  { %v1705_v39 = vadd.f32 %v3723_v37, %v4529_v43  ;;  %v1695_v40 = vpop.f32.mrb[9].mxu1 }
 0xad1   :  { %v1704_v41 = vadd.f32 %v1695_v40, %v4532_v44 }
 0xad2   :  { %v4596_v42 = vadd.f32 %v3372_v38, %v1705_v39 }
 0xad3   :  { %v4598_v45 = vadd.f32 %v3372_v38, %v1704_v41 }
 0xad4   :  { %v1722_v46 = vsel %vm179_vm4, %v4596_v42, 0.0 }
 0xad5   :  { %1723 = vadd.xlane.f32.xlu0 %v1722_v46  ;;  %v1719_v47 = vsel %vm179_vm4, %v4598_v45, 0.0 }
 0xad6   :  { %1720 = vadd.xlane.f32.xlu1 %v1719_v47 }
 0xb62   :  { %v1724_v48 = vpop.xlane.xlu0 %1723 }
 0xb63   :  { %v1726_v49 = vmul.f32 0.03125, %v1724_v48  ;;  %v1721_v50 = vpop.xlane.xlu1 %1720 }
 0xb64   :  { %v1725_v51 = vmul.f32 0.03125, %v1721_v50 }
 0xb65   :  { %v1728_v43 = vsub.f32 %v4596_v42, %v1726_v49 }
 0xb66   :  { %v1727_v44 = vsub.f32 %v4598_v45, %v1725_v51 }
 0xb67   :  { %v1730_v27 = vmul.f32 %v1728_v43, %v1728_v43 }
 0xb68   :  { %v1729_v52 = vmul.f32 %v1727_v44, %v1727_v44 }
 0xb69   :  { %v1734_v53 = vsel %vm179_vm4, %v1730_v27, 0.0 }
 0xb6a   :  { %1735 = vadd.xlane.f32.xlu0 %v1734_v53  ;;  %v1731_v26 = vsel %vm179_vm4, %v1729_v52, 0.0 }
 0xb6b   :  { %1732 = vadd.xlane.f32.xlu1 %v1731_v26 }
 0xbf7   :  { %v1736_v60 = vpop.xlane.xlu0 %1735 }
 0xbf8   :  { %v1738_v3 = vmul.f32 0.03125, %v1736_v60  ;;  %v1733_v61 = vpop.xlane.xlu1 %1732 }
 0xbf9   :  { %v1737_v62 = vmul.f32 0.03125, %v1733_v61 }
 0xbfa   :  { %v1740_v63 = vadd.f32 1e-05, %v1738_v3 }
 0xbfb   :  { %v1739_v0 = vadd.f32 1e-05, %v1737_v62 }
 0xbfc   :  { %4150 = vrsqrt.f32 %v1740_v63 }
 0xbfd   :  { %4152 = vrsqrt.f32 %v1739_v0 }
 0xc06   :  { %v4151_v1 = vpop.eup %4150 }
 0xc07   :  { %v4153_v4 = vpop.eup %4152  ;;  %v1744_v5 = vmul.f32 %v4151_v1, %v1728_v43 }
 0xc08   :  { %v1743_v6 = vmul.f32 %v4153_v4, %v1727_v44 }
 0xc09   :  { %v1752_v9 = vmul.f32 %v3375_v2, %v1744_v5 }
 0xc0a   :  { %v1751_v10 = vmul.f32 %v3375_v2, %v1743_v6 }
 0xc0b   :  { %v1760_v12 = vadd.f32 %v3376_v8, %v1752_v9 }
 0xc0c   :  { %v1759_v11 = vadd.f32 %v3376_v8, %v1751_v10 }
 0xc0e   :  { %3732 = vmatprep.mubr.msk.f32.mxu0 %vm179_vm4, %v1759_v11 }
 0xc0f   :  { %3733 = vmatmul.mubr.msk.f32.vlgmr.msra.gmra.mrb[16].mxu0 %vm179_vm4, %v1760_v12 }
 0xce2   :  { %v3734_v14 = vpop.f32.mrb[16].mxu0 }
 0xce3   :  { %v1852_v15 = vadd.f32 %v3734_v14, %v3382_v13  ;;  %v1846_v16 = vpop.f32.mrb[17].mxu0 }
 0xce4   :  { %v1847_v17 = vadd.f32 %v3382_v13, %v1846_v16 }
 0xce6   :  { %3739 = vmatprep.mubr.msk.f32.mxu0 %vm321_vm5, %v1847_v17  ;;  %v4632_v18 = vpack.i.bf16 %v1852_v15, %v1847_v17 }
 0xce8   :  { %4076 = vrot.lane.b32.xlu0 %v4632_v18, %s4222_s21  ;;  %4071 = vrot.lane.b32.xlu1 %v4632_v18, %s4221_s20 }
 0xcec   :  { %1946 = vrot.lane.b32.xlu0 %v1852_v15, %s4220_s1  ;;  %4081 = vrot.lane.b32.xlu1 %v4632_v18, %s4223_s22 }
 0xcf0   :  { %2035 = vrot.lane.b32.xlu0 %v1847_v17, %s4225_s23  ;;  %1944 = vrot.lane.b32.xlu1 %v1847_v17, %s4220_s1  ;;  %s4870_s1 = smov 56  }
 0xcf4   :  { %2126 = vrot.lane.b32.xlu0 %v1847_v17, %s4226_s24  ;;  %4086 = vrot.lane.b32.xlu1 %v4632_v18, %s4224_s2 }
 0xcf8   :  { %2037 = vrot.lane.b32.xlu1 %v1852_v15, %s4225_s23 }
 0xcfc   :  { %2128 = vrot.lane.b32.xlu1 %v1852_v15, %s4226_s24 }
 0xd5a   :  { %v4077_v19 = vpop.permute.xlu0 %4076  ;;  %v4072_v20 = vpop.permute.xlu1 %4071 }
 0xd5b   :  { %v4079_v21 = vunpack.i.h.bf16 %v4077_v19  ;;  %v4078_v22 = vunpack.i.l.bf16 %v4077_v19  ;;  %v4074_v23 = vunpack.i.h.bf16 %v4072_v20  ;;  %v4073_v24 = vunpack.i.l.bf16 %v4072_v20 }
 0xd5d   :  { %v3939_v25 = vpack.c.bf16 %v4079_v21, %v4078_v22  ;;  %v3933_v28 = vpack.c.bf16 %v4074_v23, %v4073_v24 }
 0xd5e   :  { %v1947_v29 = vpop.permute.xlu0 %1946  ;;  %v4082_v31 = vpop.permute.xlu1 %4081 }
 0xd5f   :  { %v4084_v32 = vunpack.i.h.bf16 %v4082_v31  ;;  %v4083_v34 = vunpack.i.l.bf16 %v4082_v31  ;;  %3935 = vmatprep.subr.msk.bf16.mxu0 %vm4416_vm6, %v3933_v28  ;;  %3941 = vmatprep.subr.msk.bf16.mxu1 %vm4416_vm6, %v3939_v25 }
 0xd60   :  { %3938 = vmatpush3.bf16.xpose.msk.msra.mxu0 %vm4416_vm6, %v3933_v28  ;;  %3944 = vmatpush3.bf16.xpose.msk.msra.mxu1 %vm4416_vm6, %v3939_v25 }
 0xd61   :  { %v3945_v35 = vpack.c.bf16 %v4084_v32, %v4083_v34 }
 0xd62   :  { %v2036_v36 = vpop.permute.xlu0 %2035  ;;  %v1945_v37 = vpop.permute.xlu1 %1944 }
 0xd63   :  { %3746 = vmatprep.mubr.msk.f32.mxu1 %vm321_vm5, %v1945_v37  ;;  %3947 = vmatprep.subr.msk.bf16.mxu0 %vm4416_vm6, %v3945_v35 }
 0xd66   :  { %v2127_v38 = vpop.permute.xlu0 %2126  ;;  %v4087_v39 = vpop.permute.xlu1 %4086 }
 0xd67   :  { %v4089_v40 = vunpack.i.h.bf16 %v4087_v39  ;;  %v4088_v41 = vunpack.i.l.bf16 %v4087_v39  ;;  %3740 = vmatmul.mubr.msk.f32.vlgmr.msra.gmra.mrb[18].mxu0 %vm321_vm5, %v1852_v15  ;;  %3747 = vmatmul.mubr.msk.f32.vlgmr.msra.gmra.mrb[10].mxu1 %vm321_vm5, %v1947_v29 }
 0xd68   :  { %3950 = vmatpush3.bf16.xpose.msk.msra.mxu0 %vm4416_vm6, %v3945_v35  ;;  %3753 = vmatprep.mubr.msk.f32.mxu0 %vm321_vm5, %v2036_v36 }
 0xd69   :  { %v3951_v46 = vpack.c.bf16 %v4089_v40, %v4088_v41  ;;  %3760 = vmatprep.mubr.msk.f32.mxu1 %vm321_vm5, %v2127_v38 }
 0xd6a   :  { %v2038_v47 = vpop.permute.xlu1 %2037 }
 0xd6b   :  { %3953 = vmatprep.subr.msk.bf16.mxu1 %vm4416_vm6, %v3951_v46 }
 0xd6c   :  { %3956 = vmatpush3.bf16.xpose.msk.msra.mxu1 %vm4416_vm6, %v3951_v46 }
 0xd6e   :  { %v2129_v48 = vpop.permute.xlu1 %2128 }
 0xd6f   :  { %3754 = vmatmul.mubr.msk.f32.vlgmr.msra.gmra.mrb[20].mxu0 %vm321_vm5, %v2038_v47 }
 0xd73   :  { %3761 = vmatmul.mubr.msk.f32.vlgmr.msra.gmra.mrb[12].mxu1 %vm321_vm5, %v2129_v48 }
 0xe3a   :  { %v3741_v49 = vpop.f32.mrb[18].mxu0  ;;  %v3748_v50 = vpop.f32.mrb[10].mxu1 }
 0xe3b   :  { %v2218_v51 = vmul.f32 0.35355338, %v3741_v49  ;;  %v1935_v43 = vpop.f32.mrb[19].mxu0  ;;  %v2026_v44 = vpop.f32.mrb[11].mxu1  ;;  %v2220_v54 = vmul.f32 0.35355338, %v3748_v50 }
 0xe3c   :  { %v2217_v27 = vmul.f32 0.35355338, %v1935_v43  ;;  %v2219_v52 = vmul.f32 0.35355338, %v2026_v44 }
 0xe3d   :  { %v2226_v53 = vadd.f32 %v2218_v51, %v4446_v30  ;;  %v2228_v59 = vadd.f32 %v2220_v54, %v4446_v30 }
 0xe3e   :  { %v2225_v26 = vadd.f32 %v2217_v27, %v4451_v33  ;;  %v2227_v56 = vadd.f32 %v2219_v52, %v4451_v33 }
 0xe3f   :  { %v2236_v7 = vsel %vm694_vm7, %v2226_v53, -inf  ;;  %v2242_v1 = vsel %vm694_vm7, %v2228_v59, -inf }
 0xe40   :  { %2237 = vmax.xlane.f32.xlu1 %v2236_v7  ;;  %v2233_v55 = vsel %vm694_vm7, %v2225_v26, -inf  ;;  %v2239_v61 = vsel %vm694_vm7, %v2227_v56, -inf }
 0xe41   :  { %2234 = vmax.xlane.f32.xlu0 %v2233_v55 }
 0xe42   :  { %v3755_v57 = vpop.f32.mrb[20].mxu0 }
 0xe43   :  { %v2117_v58 = vpop.f32.mrb[21].mxu0  ;;  %v2222_v60 = vmul.f32 0.35355338, %v3755_v57 }
 0xe44   :  { %v2221_v3 = vmul.f32 0.35355338, %v2117_v58 }
 0xe45   :  { %2240 = vmax.xlane.f32.xlu0 %v2239_v61  ;;  %v2230_v6 = vadd.f32 %v2222_v60, %v4446_v30 }
 0xe46   :  { %v3762_v62 = vpop.f32.mrb[12].mxu1  ;;  %v2229_v63 = vadd.f32 %v2221_v3, %v4451_v33 }
 0xe47   :  { %v2208_v0 = vpop.f32.mrb[13].mxu1  ;;  %v2224_v2 = vmul.f32 0.35355338, %v3762_v62  ;;  %v2248_v9 = vsel %vm694_vm7, %v2230_v6, -inf }
 0xe48   :  { %v2223_v4 = vmul.f32 0.35355338, %v2208_v0  ;;  %v2245_v5 = vsel %vm694_vm7, %v2229_v63, -inf }
 0xe49   :  { %2243 = vmax.xlane.f32.xlu0 %v2242_v1  ;;  %2246 = vmax.xlane.f32.xlu1 %v2245_v5  ;;  %v2232_v11 = vadd.f32 %v2224_v2, %v4446_v30 }
 0xe4a   :  { %v2231_v8 = vadd.f32 %v2223_v4, %v4451_v33 }
 0xe4b   :  { %v2254_v12 = vsel %vm694_vm7, %v2232_v11, -inf }
 0xe4c   :  { %v2251_v10 = vsel %vm694_vm7, %v2231_v8, -inf }
 0xe4d   :  { %2249 = vmax.xlane.f32.xlu0 %v2248_v9  ;;  %2252 = vmax.xlane.f32.xlu1 %v2251_v10 }
 0xe51   :  { %2255 = vmax.xlane.f32.xlu0 %v2254_v12 }
 0xe5e   :  { %4091 = vrot.lane.b32.xlu1 %v4632_v18, %s4867_s5  ;;  %s4231_s5 = smov [#allocation2]  }
 0xecd   :  { %v2238_v13 = vpop.xlane.xlu1 %2237 }
 0xece   :  { %v2258_v14 = vsub.f32 %v2226_v53, %v2238_v13  ;;  %v2235_v15 = vpop.xlane.xlu0 %2234 }
 0xecf   :  { %v2257_v16 = vsub.f32 %v2225_v26, %v2235_v15 }
 0xed0   :  { %v2267_v17 = vmul.f32 1.442695, %v2258_v14 }
 0xed1   :  { %v2265_v33 = vmul.f32 1.442695, %v2257_v16 }
 0xed2   :  { %4154 = vpow2.f32 %v2267_v17  ;;  %v2241_v19 = vpop.xlane.xlu0 %2240 }
 0xed3   :  { %4156 = vpow2.f32 %v2265_v33  ;;  %v2259_v20 = vsub.f32 %v2227_v56, %v2241_v19 }
 0xed5   :  { %v2269_v21 = vmul.f32 1.442695, %v2259_v20 }
 0xed6   :  { %v2244_v30 = vpop.xlane.xlu0 %2243  ;;  %v2247_v22 = vpop.xlane.xlu1 %2246 }
 0xed7   :  { %4158 = vpow2.f32 %v2269_v21  ;;  %v2260_v23 = vsub.f32 %v2228_v59, %v2244_v30  ;;  %v2261_v24 = vsub.f32 %v2229_v63, %v2247_v22 }
 0xed9   :  { %v2271_v25 = vmul.f32 1.442695, %v2260_v23  ;;  %v2273_v28 = vmul.f32 1.442695, %v2261_v24 }
 0xeda   :  { %v2250_v29 = vpop.xlane.xlu0 %2249  ;;  %v2253_v31 = vpop.xlane.xlu1 %2252 }
 0xedb   :  { %4160 = vpow2.f32 %v2271_v25  ;;  %v2262_v32 = vsub.f32 %v2230_v6, %v2250_v29  ;;  %v2263_v37 = vsub.f32 %v2231_v8, %v2253_v31 }
 0xedc   :  { %v4155_v34 = vpop.eup %4154  ;;  %4162 = vpow2.f32 %v2273_v28 }
 0xedd   :  { %v4157_v35 = vpop.eup %4156  ;;  %v2275_v36 = vmul.f32 1.442695, %v2262_v32  ;;  %v2284_v38 = vsel %vm694_vm7, %v4155_v34, 0.0  ;;  %v2277_v50 = vmul.f32 1.442695, %v2263_v37 }
 0xede   :  { %2285 = vadd.xlane.f32.xlu0 %v2284_v38  ;;  %v2256_v39 = vpop.xlane.xlu0 %2255  ;;  %v4092_v40 = vpop.permute.xlu1 %4091  ;;  %v2281_v41 = vsel %vm694_vm7, %v4157_v35, 0.0  ;;  %v3407_v38 = vld [vmem:[%s4836_s6 + $0x30] sm:$0xff] }
 0xedf   :  { %4164 = vpow2.f32 %v2275_v36  ;;  %v2264_v46 = vsub.f32 %v2232_v11, %v2256_v39  ;;  %v4094_v47 = vunpack.i.h.bf16 %v4092_v40  ;;  %v4093_v48 = vunpack.i.l.bf16 %v4092_v40  ;;  %2282 = vadd.xlane.f32.xlu1 %v2281_v41  ;;  %v3408_v41 = vld [vmem:[%s4836_s6 + $0x38] sm:$0xff] }
 0xee1   :  { %v4159_v49 = vpop.eup %4158  ;;  %v2279_v51 = vmul.f32 1.442695, %v2264_v46  ;;  %v3957_v43 = vpack.c.bf16 %v4094_v47, %v4093_v48 }
 0xee2   :  { %v2287_v44 = vsel %vm694_vm7, %v4159_v49, 0.0 }
 0xee3   :  { %4166 = vpow2.f32 %v2279_v51  ;;  %2288 = vadd.xlane.f32.xlu1 %v2287_v44  ;;  %3958 = vmatprep.subr.bf16.mxu0 %v3957_v43 }
 0xee4   :  { %3960 = vmatpush3.bf16.msra.mxu0 %v3957_v43  ;;  %4168 = vpow2.f32 %v2277_v50  ;;  %v3402_v50 = vld [vmem:[%s4837_s7 + $0x1] ss:$0 sm:$0xff] }
 0xee5   :  { %v4161_v27 = vpop.eup %4160 }
 0xee6   :  { %v4163_v52 = vpop.eup %4162  ;;  %v2290_v53 = vsel %vm694_vm7, %v4161_v27, 0.0 }
 0xee7   :  { %2291 = vadd.xlane.f32.xlu0 %v2290_v53  ;;  %v2293_v26 = vsel %vm694_vm7, %v4163_v52, 0.0 }
 0xee8   :  { %2294 = vadd.xlane.f32.xlu1 %v2293_v26 }
 0xee9   :  { %v4165_v54 = vpop.eup %4164 }
 0xeea   :  { %v2296_v7 = vsel %vm694_vm7, %v4165_v54, 0.0 }
 0xeeb   :  { %2297 = vadd.xlane.f32.xlu0 %v2296_v7 }
 0xeed   :  { %v4695_v55 = vpop.eup %4166 }
 0xeee   :  { %v2302_v56 = vsel %vm694_vm7, %v4695_v55, 0.0  ;;  %v4169_v57 = vpop.eup %4168 }
 0xeef   :  { %2303 = vadd.xlane.f32.xlu0 %v2302_v56  ;;  %v2299_v58 = vsel %vm694_vm7, %v4169_v57, 0.0 }
 0xef3   :  { %2300 = vadd.xlane.f32.xlu0 %v2299_v58 }
 0xef9   :  { %4101 = vrot.lane.b32.xlu1 %v4632_v18, %s4868_s8  ;;  %s3311_s8 = sshll.u32 %s4231_s5, 4  ;;  %s3312_s8 = int_to_ptr.vmem [resolvable:$true] %s3311_s8 }
 0xefa   :  { %p4199_p1 = scmp.lt.s32.totalorder %s3312_s8, %s3312_s8 }
 0xefd   :  { %4106 = vrot.lane.b32.xlu1 %v4632_v18, %s4869_s9  ;;  %s4194_s9 = scalar_lea.vmem %s3312_s8, 256 }
 0xefe   :  { %p4195_p0 = scmp.ne.s32.totalorder %s3312_s8, %s4194_s9  ;;  %p4200_p2 = scmp.lt.s32.totalorder %s4194_s9, %s4194_s9 }
 0xf00   :  { %p4201_p3 = por %p4200_p2, %p4199_p1 }
 0xf02   :  { %p4202_p4 = pnand %p4201_p3, %p4195_p0 }
 0xf09   :  { %4096 = vrot.lane.b32.xlu0 %v4632_v18, %s4870_s1 }
 0xf6b   :  { %v2286_v59 = vpop.xlane.xlu0 %2285 }
 0xf6c   :  { %4170 = vrcp.f32 %v2286_v59  ;;  %v2283_v60 = vpop.xlane.xlu1 %2282 }
 0xf6d   :  { %4172 = vrcp.f32 %v2283_v60 }
 0xf70   :  { %v2289_v3 = vpop.xlane.xlu1 %2288 }
 0xf71   :  { %4174 = vrcp.f32 %v2289_v3 }
 0xf74   :  { %v2292_v61 = vpop.xlane.xlu0 %2291 }
 0xf75   :  { %v2295_v4 = vpop.xlane.xlu1 %2294  ;;  %4176 = vrcp.f32 %v2292_v61  ;;  %v3427_v61 = vld [vmem:[%s4842_s12 + $0x20] sm:$0xff] }
 0xf76   :  { %v4171_v62 = vpop.eup %4170  ;;  %4178 = vrcp.f32 %v2295_v4  ;;  %v3435_v4 = vld [vmem:[%s4844_s14 + $0x40] sm:$0xff] }
 0xf77   :  { %v4173_v63 = vpop.eup %4172  ;;  %v2314_v2 = vmul.f32 %v4171_v62, %v4155_v34  ;;  %v3405_v34 = vld [vmem:[%s4836_s6 + $0x20] sm:$0xff]  ;;  %v3428_v62 = vld [vmem:[%s4842_s12 + $0x28] sm:$0xff] }
 0xf78   :  { %v2298_v0 = vpop.xlane.xlu0 %2297  ;;  %v2313_v1 = vmul.f32 %v4173_v63, %v4157_v35  ;;  %3770 = vmatprep.subr.mxu1 %v3405_v34  ;;  %v3406_v35 = vld [vmem:[%s4836_s6 + $0x28] sm:$0xff]  ;;  %v3973_v63 = vpack.c.bf16 %v3428_v62, %v3427_v61 }
 0xf79   :  { %v4102_v8 = vpop.permute.xlu1 %4101  ;;  %4180 = vrcp.f32 %v2298_v0  ;;  %3771 = vmatpush3.msra.mxu1 %v3405_v34  ;;  %v3429_v0 = vld [vmem:[%s4842_s12 + $0x30] sm:$0xff] }
 0xf7a   :  { %3767 = vmatprep.mubr.msk.f32.mxu0 %vm694_vm7, %v2313_v1  ;;  %v4104_v11 = vunpack.i.h.bf16 %v4102_v8  ;;  %v4103_v12 = vunpack.i.l.bf16 %v4102_v8  ;;  %3782 = vmatprep.subr.mxu1 %v3406_v35  ;;  %v3430_v1 = vld [vmem:[%s4842_s12 + $0x38] sm:$0xff] }
 0xf7b   :  { %v4175_v5 = vpop.eup %4174  ;;  %3768 = vmatmul.mubr.msk.f32.vlgmr.msra.gmra.mrb[22].mxu0 %vm694_vm7, %v2314_v2  ;;  %v3977_v2 = vpack.c.bf16 %v3430_v1, %v3429_v0  ;;  %v3438_v8 = vld [vmem:[%s4844_s14 + $0x58] sm:$0xff]  ;;  %v3447_v0 = vld [vmem:[%s4846_s16] ss:$0 sm:$0xff] }
 0xf7c   :  { %v2304_v6 = vpop.xlane.xlu0 %2303  ;;  %v2315_v18 = vmul.f32 %v4175_v5, %v4159_v49  ;;  %v3965_v19 = vpack.c.bf16 %v4104_v11, %v4103_v12  ;;  %v3436_v5 = vld [vmem:[%s4844_s14 + $0x48] sm:$0xff] }
 0xf7d   :  { %v4107_v15 = vpop.permute.xlu1 %4106  ;;  %v3440_v11 = vld [vmem:[%s4844_s14 + $0x68] sm:$0xff] }
 0xf7e   :  { %3779 = vmatprep.mubr.msk.f32.mxu0 %vm694_vm7, %v2315_v18  ;;  %v4109_v20 = vunpack.i.h.bf16 %v4107_v15  ;;  %v4108_v21 = vunpack.i.l.bf16 %v4107_v15  ;;  %v3981_v18 = vpack.c.bf16 %v3436_v5, %v3435_v4  ;;  %v3448_v5 = vld [vmem:[%s4847_s17] ss:$0 sm:$0xff] }
 0xf7f   :  { %v4177_v17 = vpop.eup %4176 }
 0xf80   :  { %v2301_v9 = vpop.xlane.xlu0 %2300  ;;  %v4179_v33 = vpop.eup %4178  ;;  %v2316_v30 = vmul.f32 %v4177_v17, %v4161_v27  ;;  %v3969_v25 = vpack.c.bf16 %v4109_v20, %v4108_v21  ;;  %v3425_v20 = vld [vmem:[%s4840_s10 + $0x1] ss:$0 sm:$0xff] }
 0xf81   :  { %4182 = vrcp.f32 %v2301_v9  ;;  %v2317_v23 = vmul.f32 %v4179_v33, %v4163_v52 }
 0xf82   :  { %4184 = vrcp.f32 %v2304_v6  ;;  %v3437_v6 = vld [vmem:[%s4844_s14 + $0x50] sm:$0xff] }
 0xf83   :  { %v4181_v22 = vpop.eup %4180  ;;  %v3985_v9 = vpack.c.bf16 %v3438_v8, %v3437_v6 }
 0xf84   :  { %v4097_v10 = vpop.permute.xlu0 %4096  ;;  %v2318_v28 = vmul.f32 %v4181_v22, %v4165_v54 }
 0xf85   :  { %v4099_v13 = vunpack.i.h.bf16 %v4097_v10  ;;  %v4098_v14 = vunpack.i.l.bf16 %v4097_v10  ;;  %v3439_v10 = vld [vmem:[%s4844_s14 + $0x60] sm:$0xff] }
 0xf86   :  { %v3989_v12 = vpack.c.bf16 %v3440_v11, %v3439_v10 }
 0xf87   :  { %v3961_v16 = vpack.c.bf16 %v4099_v13, %v4098_v14 }
 0xf89   :  { %3962 = vmatprep.subr.bf16.mxu0 %v3961_v16 }
 0xf8a   :  { %3964 = vmatpush3.bf16.msra.mxu0 %v3961_v16 }
 0xf8b   :  { %3966 = vmatprep.subr.bf16.mxu0 %v3965_v19  ;;  %v4183_v24 = vpop.eup %4182 }
 0xf8c   :  { %v4185_v29 = vpop.eup %4184  ;;  %v2319_v31 = vmul.f32 %v4183_v24, %v4169_v57 }
 0xf8d   :  { %3780 = vmatmul.mubr.msk.f32.vlgmr.msra.gmra.mrb[24].mxu0 %vm694_vm7, %v2316_v30  ;;  %v2320_v32 = vmul.f32 %v4185_v29, %v4695_v55 }
 0xf8e   :  { %3968 = vmatpush3.bf16.msra.mxu0 %v3965_v19  ;;  %3791 = vmatprep.mubr.msk.f32.mxu0 %vm694_vm7, %v2317_v23  ;;  %v3426_v23 = vld [vmem:[%s4841_s11 + $0x1] ss:$0 sm:$0xff] }
 0xf8f   :  { %3970 = vmatprep.subr.bf16.mxu0 %v3969_v25 }
 0xf91   :  { %3792 = vmatmul.mubr.msk.f32.vlgmr.msra.gmra.mrb[26].mxu0 %vm694_vm7, %v2318_v28 }
 0xf92   :  { %3972 = vmatpush3.bf16.msra.mxu0 %v3969_v25  ;;  %3803 = vmatprep.mubr.msk.f32.mxu0 %vm694_vm7, %v2319_v31  ;;  %v3441_v31 = vld [vmem:[%s4844_s14 + $0x70] sm:$0xff] }
 0xf93   :  { %3974 = vmatprep.subr.bf16.mxu0 %v3973_v63 }
 0xf95   :  { %3804 = vmatmul.mubr.msk.f32.vlgmr.msra.gmra.mrb[28].mxu0 %vm694_vm7, %v2320_v32  ;;  %v3442_v32 = vld [vmem:[%s4844_s14 + $0x78] sm:$0xff] }
 0xf96   :  { %3976 = vmatpush3.bf16.msra.mxu0 %v3973_v63  ;;  %v3993_v34 = vpack.c.bf16 %v3442_v32, %v3441_v31 }
 0xf97   :  { %3978 = vmatprep.subr.bf16.mxu0 %v3977_v2 }
 0xf9a   :  { %3980 = vmatpush3.bf16.msra.mxu0 %v3977_v2 }
0x104e   :  { %v3769_v36 = vpop.f32.mrb[22].mxu0 }
0x104f   :  { %v2407_v37 = vpop.f32.mrb[23].mxu0 }
0x1050   :  { %3772 = vmatprep.mubr.msk.f32.mxu1 %vm321_vm5, %v2407_v37 }
0x1051   :  { %3773 = vmatmul.mubr.msk.f32.vlgmr.msra.gmra.mrb[14].mxu1 %vm321_vm5, %v3769_v36 }
0x1052   :  { %3783 = vmatpush3.msra.mxu1 %v3406_v35  ;;  %v3432_v35 = vld [vmem:[%s4866_s3 + $0x1] ss:$0 sm:$0xff] }
0x1053   :  { %3794 = vmatprep.subr.mxu1 %v3407_v38 }
0x1060   :  { %v3781_v39 = vpop.f32.mrb[24].mxu0 }
0x1061   :  { %v2582_v40 = vpop.f32.mrb[25].mxu0 }
0x1062   :  { %3784 = vmatprep.mubr.msk.f32.mxu1 %vm321_vm5, %v2582_v40 }
0x1063   :  { %3785 = vmatmul.mubr.msk.f32.vlgmr.msra.gmra.mrb[14].mxu1 %vm321_vm5, %v3781_v39 }
0x1064   :  { %v3793_v46 = vpop.f32.mrb[26].mxu0  ;;  %3795 = vmatpush3.msra.mxu1 %v3407_v38 }
0x1065   :  { %v2752_v47 = vpop.f32.mrb[27].mxu0  ;;  %3806 = vmatprep.subr.mxu1 %v3408_v41 }
0x1066   :  { %3796 = vmatprep.mubr.msk.f32.mxu1 %vm321_vm5, %v2752_v47  ;;  %v3446_v47 = vld [vmem:[%s4845_s15 + $0x1] ss:$0 sm:$0xff] }
0x1068   :  { %v3805_v48 = vpop.f32.mrb[28].mxu0 }
0x1069   :  { %v2922_v49 = vpop.f32.mrb[29].mxu0 }
0x106b   :  { %3797 = vmatmul.mubr.msk.f32.vlgmr.msra.gmra.mrb[14].mxu1 %vm321_vm5, %v3793_v46 }
0x106c   :  { %3807 = vmatpush3.msra.mxu1 %v3408_v41  ;;  %3808 = vmatprep.mubr.msk.f32.mxu1 %vm321_vm5, %v2922_v49 }
0x106d   :  { %3982 = vmatprep.subr.bf16.mxu1 %v3981_v18 }
0x1073   :  { %3809 = vmatmul.mubr.msk.f32.vlgmr.msra.gmra.mrb[14].mxu1 %vm321_vm5, %v3805_v48 }
0x1074   :  { %3984 = vmatpush3.bf16.msra.mxu1 %v3981_v18 }
0x1075   :  { %3986 = vmatprep.subr.bf16.mxu1 %v3985_v9 }
0x1078   :  { %3988 = vmatpush3.bf16.msra.mxu1 %v3985_v9 }
0x1079   :  { %3990 = vmatprep.subr.bf16.mxu1 %v3989_v12 }
0x107c   :  { %3992 = vmatpush3.bf16.msra.mxu1 %v3989_v12 }
0x107d   :  { %3994 = vmatprep.subr.bf16.mxu1 %v3993_v34 }
0x1080   :  { %3996 = vmatpush3.bf16.msra.mxu1 %v3993_v34 }
0x1146   :  { %v3810_v51 = vpop.f32.mrb[14].mxu1 }
0x1147   :  { %v3999_v43 = vadd.f32 %v3810_v51, %v3402_v50  ;;  %v3003_v44 = vpop.f32.mrb[15].mxu1 }
0x1148   :  { %v4000_v27 = vadd.f32 %v3402_v50, %v3003_v44 }
0x1149   :  { %v4739_v52 = vadd.f32 %v3999_v43, %v4596_v42 }
0x114a   :  { %v4742_v53 = vadd.f32 %v4000_v27, %v4598_v45 }
0x114b   :  { %v3023_v26 = vsel %vm179_vm4, %v4739_v52, 0.0 }
0x114c   :  { %3024 = vadd.xlane.f32.xlu0 %v3023_v26  ;;  %v3020_v54 = vsel %vm179_vm4, %v4742_v53, 0.0 }
0x114d   :  { %3021 = vadd.xlane.f32.xlu1 %v3020_v54 }
0x11d9   :  { %v3025_v7 = vpop.xlane.xlu0 %3024 }
0x11da   :  { %v3027_v55 = vmul.f32 0.03125, %v3025_v7  ;;  %v3022_v56 = vpop.xlane.xlu1 %3021 }
0x11db   :  { %v3026_v57 = vmul.f32 0.03125, %v3022_v56 }
0x11dc   :  { %v3029_v58 = vsub.f32 %v4739_v52, %v3027_v55 }
0x11dd   :  { %v3028_v42 = vsub.f32 %v4742_v53, %v3026_v57 }
0x11de   :  { %v3031_v59 = vmul.f32 %v3029_v58, %v3029_v58 }
0x11df   :  { %v3030_v60 = vmul.f32 %v3028_v42, %v3028_v42 }
0x11e0   :  { %v3035_v45 = vsel %vm179_vm4, %v3031_v59, 0.0 }
0x11e1   :  { %3036 = vadd.xlane.f32.xlu0 %v3035_v45  ;;  %v3032_v3 = vsel %vm179_vm4, %v3030_v60, 0.0 }
0x11e2   :  { %3033 = vadd.xlane.f32.xlu1 %v3032_v3 }
0x126e   :  { %v3037_v13 = vpop.xlane.xlu0 %3036 }
0x126f   :  { %v3039_v14 = vmul.f32 0.03125, %v3037_v13  ;;  %v3034_v15 = vpop.xlane.xlu1 %3033 }
0x1270   :  { %v3038_v16 = vmul.f32 0.03125, %v3034_v15 }
0x1271   :  { %v3041_v17 = vadd.f32 1e-05, %v3039_v14 }
0x1272   :  { %v3040_v33 = vadd.f32 1e-05, %v3038_v16 }
0x1273   :  { %4186 = vrsqrt.f32 %v3041_v17 }
0x1274   :  { %4188 = vrsqrt.f32 %v3040_v33 }
0x127d   :  { %v4187_v19 = vpop.eup %4186 }
0x127e   :  { %v4189_v21 = vpop.eup %4188  ;;  %v3045_v30 = vmul.f32 %v4187_v19, %v3029_v58 }
0x127f   :  { %v3044_v22 = vmul.f32 %v4189_v21, %v3028_v42 }
0x1280   :  { %v3053_v24 = vmul.f32 %v3425_v20, %v3045_v30 }
0x1281   :  { %v3052_v25 = vmul.f32 %v3425_v20, %v3044_v22 }
0x1282   :  { %v3061_v29 = vadd.f32 %v3426_v23, %v3053_v24 }
0x1283   :  { %v3060_v28 = vadd.f32 %v3426_v23, %v3052_v25 }
0x1285   :  { %3819 = vmatprep.mubr.msk.f32.mxu0 %vm179_vm4, %v3060_v28 }
0x1286   :  { %3820 = vmatmul.mubr.msk.f32.vlgmr.msra.gmra.mrb[30].mxu0 %vm179_vm4, %v3061_v29 }
0x1359   :  { %v3821_v36 = vpop.f32.mrb[30].mxu0 }
0x135a   :  { %v3153_v37 = vadd.f32 %v3821_v36, %v3432_v35  ;;  %v3147_v38 = vpop.f32.mrb[31].mxu0 }
0x135b   :  { %v3148_v39 = vadd.f32 %v3432_v35, %v3147_v38 }
0x135c   :  { %v3157_v41 = vmax.f32 %v3153_v37, 0.0 }
0x135d   :  { %v3156_v40 = vmax.f32 %v3148_v39, 0.0 }
0x135f   :  { %3838 = vmatprep.mubr.msk.f32.mxu1 %vm1622_vm8, %v3156_v40 }
0x1360   :  { %3839 = vmatmul.mubr.msk.f32.vlgmr.msra.gmra.mrb[16].mxu1 %vm1622_vm8, %v3157_v41 }
0x1433   :  { %v3840_v46 = vpop.f32.mrb[16].mxu1 }
0x1434   :  { %v3249_v48 = vadd.f32 %v3840_v46, %v4739_v52  ;;  %v3239_v49 = vpop.f32.mrb[17].mxu1 }
0x1435   :  { %v3248_v50 = vadd.f32 %v3239_v49, %v4742_v53 }
0x1436   :  { %v3259_v51 = vadd.f32 %v3446_v47, %v3249_v48 }
0x1437   :  { %v3258_v43 = vadd.f32 %v3446_v47, %v3248_v50 }
0x1438   :  { %v3265_v44 = vsel %vm179_vm4, %v3259_v51, 0.0 }
0x1439   :  { %3266 = vadd.xlane.f32.xlu0 %v3265_v44  ;;  %v3262_v27 = vsel %vm179_vm4, %v3258_v43, 0.0 }
0x143a   :  { %3263 = vadd.xlane.f32.xlu1 %v3262_v27 }
0x14c6   :  { %v3267_v26 = vpop.xlane.xlu0 %3266 }
0x14c7   :  { %v3269_v54 = vmul.f32 0.03125, %v3267_v26  ;;  %v3264_v7 = vpop.xlane.xlu1 %3263 }
0x14c8   :  { %v3268_v55 = vmul.f32 0.03125, %v3264_v7 }
0x14c9   :  { %v3271_v56 = vsub.f32 %v3259_v51, %v3269_v54 }
0x14ca   :  { %v3270_v57 = vsub.f32 %v3258_v43, %v3268_v55 }
0x14cb   :  { %v3273_v58 = vmul.f32 %v3271_v56, %v3271_v56 }
0x14cc   :  { %v3272_v42 = vmul.f32 %v3270_v57, %v3270_v57 }
0x14cd   :  { %v3277_v52 = vsel %vm179_vm4, %v3273_v58, 0.0 }
0x14ce   :  { %3278 = vadd.xlane.f32.xlu0 %v3277_v52  ;;  %v3274_v53 = vsel %vm179_vm4, %v3272_v42, 0.0 }
0x14cf   :  { %3275 = vadd.xlane.f32.xlu1 %v3274_v53 }
0x155b   :  { %v3279_v59 = vpop.xlane.xlu0 %3278 }
0x155c   :  { %v3281_v60 = vmul.f32 0.03125, %v3279_v59  ;;  %v3276_v45 = vpop.xlane.xlu1 %3275 }
0x155d   :  { %v3280_v3 = vmul.f32 0.03125, %v3276_v45 }
0x155e   :  { %v3283_v61 = vadd.f32 1e-05, %v3281_v60 }
0x155f   :  { %v3282_v62 = vadd.f32 1e-05, %v3280_v3 }
0x1560   :  { %4190 = vrsqrt.f32 %v3283_v61 }
0x1561   :  { %4192 = vrsqrt.f32 %v3282_v62 }
0x156a   :  { %v4191_v63 = vpop.eup %4190 }
0x156b   :  { %v4193_v1 = vpop.eup %4192  ;;  %v3287_v2 = vmul.f32 %v4191_v63, %v3271_v56 }
0x156c   :  { %v3286_v4 = vmul.f32 %v4193_v1, %v3270_v57 }
0x156d   :  { %v3295_v6 = vmul.f32 %v3447_v0, %v3287_v2 }
0x156e   :  { %v3294_v18 = vmul.f32 %v3447_v0, %v3286_v4 }
0x156f   :  { %v3303_v8 = vadd.f32 %v3448_v5, %v3295_v6 }
0x1570   :  { %v3302_v9 = vadd.f32 %v3448_v5, %v3294_v18 }
0x1571   :  { %3305 = vst.msk [vmem:[#allocation2 + $0x8] sm:$0xff] %vm179_vm4, %v3303_v8 }
0x1572   :  { %3304 = vst.msk [vmem:[#allocation2] sm:$0xff] %vm179_vm4, %v3302_v9 }
0x1573   :  { %4205 = shalt.err (!%p4202_p4)
}
0x1574   :  { %s4206_s1 = scalar_lea.hbm %s4848_s18, 256 }
0x1575   :  { %p4207_p5 = scmp.ne.s32.totalorder %s4848_s18, %s4206_s1  ;;  %p4210_p6 = scmp.lt.u32.totalorder %s4206_s1, %s4848_s18 }
0x1577   :  { %p4212_p7 = pnand %p4210_p6, %p4207_p5 }
0x1579   :  { %4215 = shalt.err (!%p4212_p7)
}
0x157a   :  { %s4232_s2 = smov 128   ;;  %s4233_s23 = smov 8  }
0x157b   :  { %3317 = dma.vmem_to_hbm [thread:$0]  %s3312_s8, 256, %s4848_s18, [#allocation3], %s4232_s2, %s4232_s2, %s4233_s23  }
0x157c   :  { %4216 = dma.done.wait [#allocation3], 256  }
0x157d   :  { %4217 = vsyncadd [#allocation3], 4294967040 }
0x157e   :  { %3321 = vsyncpa [#allocation3], 1 }

</bundles_post_ra>
